<compile_context>
chip_gen: v5e
topology: v5e:2x2
jax: 0.10.0
libtpu: 0.0.40
codegen_flags: <defaults>
</compile_context>

<pallas_src>
import math

import jax
import jax.numpy as jnp
from jax import lax
from jax.experimental import pallas as pl
from jax.experimental.pallas import tpu as pltpu


def _round_up(x, m):
    return (x + m - 1) // m * m


# ---------------------------------------------------------------------------
# Kernel
# ---------------------------------------------------------------------------
def make_rnn_fc_kernel(num_layers, T, bt, Dp, Hp, unroll, mm_dtype, hoist_whh):
    """Ref order: (x, [wihT, whhT, b] * L, wfcT, bfc, out, seq_scratch).

    Weights are pre-transposed, zero-padded, and stored in `mm_dtype`.
    Biases are f32 (b = b_ih + b_hh fused).  out_ref doubles as the per-layer
    pre-activation buffer (see module docstring invariant).
    """

    def kernel(*refs):
        x_ref = refs[0]
        idx = 1
        layer_refs = []
        for _ in range(num_layers):
            layer_refs.append((refs[idx], refs[idx + 1], refs[idx + 2]))
            idx += 3
        wfc_ref = refs[idx]
        bfc_ref = refs[idx + 1]
        out_ref = refs[idx + 2]
        seq_ref = refs[idx + 3]   # VMEM scratch (T, bt, Hp): layer hidden outputs

        # --- stacked tanh RNN layers (PyTorch nn.RNN semantics, h0 = 0) ---
        for l, (wih_ref, whh_ref, b_ref) in enumerate(layer_refs):
            # Batched input projection: one MXU matmul for all timesteps with the
            # fused bias folded in, off the serial critical path.
            if l == 0:
                flat_in = x_ref[...].reshape(T * bt, Dp)
            else:
                flat_in = seq_ref[...].reshape(T * bt, Hp)
            pre = (
                jnp.dot(flat_in.astype(mm_dtype), wih_ref[...],
                        preferred_element_type=jnp.float32)
                + b_ref[...]
            )
            # out_ref is the pre-activation buffer until the final FC overwrites it.
            # The FULL pre tensor is materialised here BEFORE seq_ref is touched.
            out_ref[...] = pre.reshape(T, bt, Hp)

            # Keep W_hh resident across the recurrence when it fits in vregs.
            whh_resident = whh_ref[...] if hoist_whh else None

            # Serial recurrence: only h @ W_hh + tanh remains per step.
            def step(t, h, whh_resident=whh_resident, whh_ref=whh_ref):
                w = whh_resident if hoist_whh else whh_ref[...]
                h_new = jnp.tanh(
                    out_ref[t]
                    + jnp.dot(h.astype(mm_dtype), w,
                              preferred_element_type=jnp.float32)
                )
                seq_ref[t] = h_new
                return h_new

            lax.fori_loop(0, T, step, jnp.zeros((bt, Hp), jnp.float32),
                          unroll=unroll)

        # --- final Linear(hidden, hidden): one matmul, one lane-dense store ---
        flat_h = seq_ref[...].reshape(T * bt, Hp).astype(mm_dtype)
        out = (
            jnp.dot(flat_h, wfc_ref[...], preferred_element_type=jnp.float32)
            + bfc_ref[...]
        )
        out_ref[...] = out.reshape(T, bt, Hp)

    return kernel


# ---------------------------------------------------------------------------
# Wrapper: layout, padding to (8,128) tiles, weight transpose/cast, bias fuse
# ---------------------------------------------------------------------------
def net_forward_pallas(x_btd, params, *, matmul_dtype=jnp.bfloat16):
    """x_btd: (B, T, D) float32  ->  (B, T, H) float32."""
    B, T, D = x_btd.shape
    H = params["fc_w"].shape[0]
    num_layers = len(params["rnn"])

    Bp = _round_up(B, 8)      # sublane alignment
    Dp = _round_up(D, 128)    # lane alignment
    Hp = _round_up(H, 128)

    # Batch-parallel grid: split only if each tile keeps >= 128 MXU rows.
    if Bp >= 256:
        b_tile = _round_up((Bp + 1) // 2, 8)
        Bp = 2 * b_tile
        n_btiles = 2
    else:
        b_tile = Bp
        n_btiles = 1

    x = x_btd.astype(jnp.float32)
    x = jnp.pad(x, ((0, Bp - B), (0, 0), (0, Dp - D)))
    x_tbd = jnp.transpose(x, (1, 0, 2))  # time-major (T, Bp, Dp)

    inputs = [x_tbd]
    in_specs = [pl.BlockSpec((T, b_tile, Dp), lambda b: (0, b, 0))]
    w_bytes = 0
    itemsize_w = jnp.dtype(matmul_dtype).itemsize
    for l, (wih, whh, bih, bhh) in enumerate(params["rnn"]):
        d_in = D if l == 0 else H
        d_in_p = Dp if l == 0 else Hp
        wih_t = jnp.transpose(wih).astype(jnp.float32)            # (d_in, H)
        wih_t = jnp.pad(wih_t, ((0, d_in_p - d_in), (0, Hp - H))).astype(matmul_dtype)
        whh_t = jnp.transpose(whh).astype(jnp.float32)            # (H, H)
        whh_t = jnp.pad(whh_t, ((0, Hp - H), (0, Hp - H))).astype(matmul_dtype)
        b = (bih + bhh).astype(jnp.float32)                       # fused bias (f32)
        b = jnp.pad(b, (0, Hp - H)).reshape(1, Hp)
        inputs += [wih_t, whh_t, b]
        in_specs += [pl.BlockSpec((d_in_p, Hp), lambda b: (0, 0)),
                     pl.BlockSpec((Hp, Hp), lambda b: (0, 0)),
                     pl.BlockSpec((1, Hp), lambda b: (0, 0))]
        w_bytes += (d_in_p * Hp + Hp * Hp) * itemsize_w + Hp * 4

    wfc_t = jnp.transpose(params["fc_w"]).astype(jnp.float32)
    wfc_t = jnp.pad(wfc_t, ((0, Hp - H), (0, Hp - H))).astype(matmul_dtype)
    bfc = jnp.pad(params["fc_b"].astype(jnp.float32), (0, Hp - H)).reshape(1, Hp)
    inputs += [wfc_t, bfc]
    in_specs += [pl.BlockSpec((Hp, Hp), lambda b: (0, 0)),
                 pl.BlockSpec((1, Hp), lambda b: (0, 0))]
    w_bytes += Hp * Hp * itemsize_w + Hp * 4

    # VMEM footprint: double-buffered x/out blocks + weights (counted x2,
    # conservative) + one (T, b_tile, Hp) f32 scratch + compiler slack.
    act_bytes = 2 * (T * b_tile * Dp * 4 + T * b_tile * Hp * 4)
    scratch_bytes = T * b_tile * Hp * 4
    footprint = act_bytes + 2 * w_bytes + scratch_bytes
    vmem_limit = int(min(max(int(footprint * 1.5) + (8 << 20), 32 << 20), 100 << 20))

    # Full unroll for short recurrences; partial unroll (LLO slack) otherwise.
    unroll = True if T * num_layers <= 64 else 8
    hoist_whh = Hp <= 128   # keep W_hh in vregs across the serial loop

    out_tbh = pl.pallas_call(
        make_rnn_fc_kernel(num_layers, T, b_tile, Dp, Hp, unroll,
                           matmul_dtype, hoist_whh),
        out_shape=jax.ShapeDtypeStruct((T, Bp, Hp), jnp.float32),
        grid_spec=pltpu.PrefetchScalarGridSpec(
            num_scalar_prefetch=0,
            grid=(n_btiles,),
            in_specs=in_specs,
            out_specs=pl.BlockSpec((T, b_tile, Hp), lambda b: (0, b, 0)),
            scratch_shapes=[pltpu.VMEM((T, b_tile, Hp), jnp.float32)],
        ),
        compiler_params=pltpu.CompilerParams(
            dimension_semantics=("parallel",),
            vmem_limit_bytes=vmem_limit,
        ),
    )(*inputs)

    out = jnp.transpose(out_tbh, (1, 0, 2))  # back to batch_first (Bp, T, Hp)
    return out[:B, :, :H]


# ---------------------------------------------------------------------------
# Deterministic parameter init (matches PyTorch shapes / init distributions)
# ---------------------------------------------------------------------------
def init_params(key, input_dim, hidden_dim, layers):
    params = {"rnn": []}
    k_rnn = 1.0 / math.sqrt(hidden_dim)
    for l in range(layers):
        d_in = input_dim if l == 0 else hidden_dim
        key, k1, k2, k3, k4 = jax.random.split(key, 5)
        wih = jax.random.uniform(k1, (hidden_dim, d_in), jnp.float32, -k_rnn, k_rnn)
        whh = jax.random.uniform(k2, (hidden_dim, hidden_dim), jnp.float32, -k_rnn, k_rnn)
        bih = jax.random.uniform(k3, (hidden_dim,), jnp.float32, -k_rnn, k_rnn)
        bhh = jax.random.uniform(k4, (hidden_dim,), jnp.float32, -k_rnn, k_rnn)
        params["rnn"].append((wih, whh, bih, bhh))
    key, k5, k6 = jax.random.split(key, 3)
    k_fc = 1.0 / math.sqrt(hidden_dim)
    params["fc_w"] = jax.random.uniform(k5, (hidden_dim, hidden_dim), jnp.float32, -k_fc, k_fc)
    params["fc_b"] = jax.random.uniform(k6, (hidden_dim,), jnp.float32, -k_fc, k_fc)
    return params


# ---------------------------------------------------------------------------
# Pure-JAX reference (mirrors torch semantics) for a sanity check
# ---------------------------------------------------------------------------
def net_forward_ref(x_btd, params):
    cur = x_btd
    for (wih, whh, bih, bhh) in params["rnn"]:
        B, T, _ = cur.shape
        H = wih.shape[0]
        h = jnp.zeros((B, H), jnp.float32)
        outs = []
        for t in range(T):
            h = jnp.tanh(cur[:, t] @ wih.T + bih + h @ whh.T + bhh)
            outs.append(h)
        cur = jnp.stack(outs, axis=1)
    return cur @ params["fc_w"].T + params["fc_b"]


if __name__ == "__main__":
    # Small shapes consistent with the module: x is one-hot char sequences,
    # so input_dim plays the role of dic_size.
    B, T, D, H, LAYERS = 2, 8, 16, 32, 2

    key = jax.random.PRNGKey(0)
    key, kx = jax.random.split(key)
    x = jax.random.normal(kx, (B, T, D), jnp.float32)

    params = init_params(jax.random.PRNGKey(1), D, H, LAYERS)
    ref = net_forward_ref(x, params)

    # Exact path (f32 MXU operands): tight tolerance vs. reference.
    out_f32 = jax.block_until_ready(
        net_forward_pallas(x, params, matmul_dtype=jnp.float32))
    assert out_f32.shape == (B, T, H)
    assert jnp.allclose(out_f32, ref, rtol=1e-3, atol=1e-3)

    # Perf default (bf16 MXU operands, f32 accumulation): bf16-level tolerance.
    out_bf16 = jax.block_until_ready(net_forward_pallas(x, params))
    assert out_bf16.shape == (B, T, H)
    assert jnp.allclose(out_bf16, ref, rtol=3e-2, atol=3e-2)

    print("KERNEL_OK")
</pallas_src>

<mosaic_0001>
module attributes {stable_mosaic.version = 11 : i64} {
  func.func @kernel(%arg0: i32, %arg1: memref<8x8x128xf32, #tpu.memory_space<vmem>>, %arg2: memref<128x128xf32, #tpu.memory_space<vmem>>, %arg3: memref<128x128xf32, #tpu.memory_space<vmem>>, %arg4: memref<1x128xf32, #tpu.memory_space<vmem>>, %arg5: memref<128x128xf32, #tpu.memory_space<vmem>>, %arg6: memref<128x128xf32, #tpu.memory_space<vmem>>, %arg7: memref<1x128xf32, #tpu.memory_space<vmem>>, %arg8: memref<128x128xf32, #tpu.memory_space<vmem>>, %arg9: memref<1x128xf32, #tpu.memory_space<vmem>>, %arg10: memref<8x8x128xf32, #tpu.memory_space<vmem>>, %arg11: memref<8x8x128xf32, #tpu.memory_space<vmem>>) attributes {dimension_semantics = [#tpu.dimension_semantics<parallel>], iteration_bounds = array<i64: 1>, scalar_prefetch = 0 : i64, scratch_operands = 1 : i64, tpu.core_type = #tpu.core_type<tc>, window_params = [{transform_indices = @transform_0, window_bounds = array<i64: 8, 8, 128>}, {pipeline_mode = #tpu.pipeline_mode<synchronous>, transform_indices = @transform_1, window_bounds = array<i64: 128, 128>}, {pipeline_mode = #tpu.pipeline_mode<synchronous>, transform_indices = @transform_2, window_bounds = array<i64: 128, 128>}, {pipeline_mode = #tpu.pipeline_mode<synchronous>, transform_indices = @transform_3, window_bounds = array<i64: 1, 128>}, {pipeline_mode = #tpu.pipeline_mode<synchronous>, transform_indices = @transform_4, window_bounds = array<i64: 128, 128>}, {pipeline_mode = #tpu.pipeline_mode<synchronous>, transform_indices = @transform_5, window_bounds = array<i64: 128, 128>}, {pipeline_mode = #tpu.pipeline_mode<synchronous>, transform_indices = @transform_6, window_bounds = array<i64: 1, 128>}, {pipeline_mode = #tpu.pipeline_mode<synchronous>, transform_indices = @transform_7, window_bounds = array<i64: 128, 128>}, {pipeline_mode = #tpu.pipeline_mode<synchronous>, transform_indices = @transform_8, window_bounds = array<i64: 1, 128>}, {transform_indices = @transform_9, window_bounds = array<i64: 8, 8, 128>}]} {
    %c0 = arith.constant 0 : index
    %c0_0 = arith.constant 0 : index
    %c0_1 = arith.constant 0 : index
    %0 = vector.load %arg1[%c0, %c0_0, %c0_1] : memref<8x8x128xf32, #tpu.memory_space<vmem>>, vector<8x8x128xf32>
    %1 = vector.shape_cast %0 : vector<8x8x128xf32> to vector<64x128xf32>
    %c0_2 = arith.constant 0 : index
    %c0_3 = arith.constant 0 : index
    %2 = vector.load %arg2[%c0_2, %c0_3] : memref<128x128xf32, #tpu.memory_space<vmem>>, vector<128x128xf32>
    %cst = arith.constant dense<0.000000e+00> : vector<64x128xf32>
    %3 = tpu.matmul %1, %2, %cst {dimension_numbers = #tpu.dot_dimension_numbers<[1], [0], [0], [1], [0, 0, 1, 1], [], []>} : vector<64x128xf32>, vector<128x128xf32>, vector<64x128xf32> -> vector<64x128xf32>
    %c0_4 = arith.constant 0 : index
    %c0_5 = arith.constant 0 : index
    %4 = vector.load %arg4[%c0_4, %c0_5] : memref<1x128xf32, #tpu.memory_space<vmem>>, vector<1x128xf32>
    %5 = vector.broadcast %4 : vector<1x128xf32> to vector<64x128xf32>
    %6 = arith.addf %3, %5 : vector<64x128xf32>
    %7 = vector.shape_cast %6 : vector<64x128xf32> to vector<8x8x128xf32>
    %c0_6 = arith.constant 0 : index
    %c0_7 = arith.constant 0 : index
    %c0_8 = arith.constant 0 : index
    %8 = vector.load %arg10[%c0_6, %c0_7, %c0_8] : memref<8x8x128xf32, #tpu.memory_space<vmem>>, vector<8x8x128xf32>
    tpu.vector_store %arg10[%c0_6, %c0_7, %c0_8], %7 {strides = array<i32>} : memref<8x8x128xf32, #tpu.memory_space<vmem>>, vector<8x8x128xf32>,
    %c0_9 = arith.constant 0 : index
    %c0_10 = arith.constant 0 : index
    %9 = vector.load %arg3[%c0_9, %c0_10] : memref<128x128xf32, #tpu.memory_space<vmem>>, vector<128x128xf32>
    %cst_11 = arith.constant 0.000000e+00 : f32
    %10 = vector.broadcast %cst_11 : f32 to vector<8x128xf32>
    %c0_i32 = arith.constant 0 : i32
    %11 = arith.index_cast %c0_i32 : i32 to index
    %c0_12 = arith.constant 0 : index
    %c0_13 = arith.constant 0 : index
    %12 = vector.load %arg10[%11, %c0_12, %c0_13] : memref<8x8x128xf32, #tpu.memory_space<vmem>>, vector<1x8x128xf32>
    %13 = vector.shape_cast %12 : vector<1x8x128xf32> to vector<8x128xf32>
    %cst_14 = arith.constant dense<0.000000e+00> : vector<8x128xf32>
    %14 = tpu.matmul %10, %9, %cst_14 {dimension_numbers = #tpu.dot_dimension_numbers<[1], [0], [0], [1], [0, 0, 1, 1], [], []>} : vector<8x128xf32>, vector<128x128xf32>, vector<8x128xf32> -> vector<8x128xf32>
    %15 = arith.addf %13, %14 : vector<8x128xf32>
    %16 = math.tanh %15 : vector<8x128xf32>
    %17 = arith.index_cast %c0_i32 : i32 to index
    %c0_15 = arith.constant 0 : index
    %c0_16 = arith.constant 0 : index
    %18 = vector.load %arg11[%17, %c0_15, %c0_16] : memref<8x8x128xf32, #tpu.memory_space<vmem>>, vector<1x8x128xf32>
    %19 = vector.shape_cast %18 : vector<1x8x128xf32> to vector<8x128xf32>
    %20 = vector.shape_cast %16 : vector<8x128xf32> to vector<1x8x128xf32>
    tpu.vector_store %arg11[%17, %c0_15, %c0_16], %20 {strides = array<i32>} : memref<8x8x128xf32, #tpu.memory_space<vmem>>, vector<1x8x128xf32>,
    %c1_i32 = arith.constant 1 : i32
    %21 = arith.index_cast %c1_i32 : i32 to index
    %c0_17 = arith.constant 0 : index
    %c0_18 = arith.constant 0 : index
    %22 = vector.load %arg10[%21, %c0_17, %c0_18] : memref<8x8x128xf32, #tpu.memory_space<vmem>>, vector<1x8x128xf32>
    %23 = vector.shape_cast %22 : vector<1x8x128xf32> to vector<8x128xf32>
    %cst_19 = arith.constant dense<0.000000e+00> : vector<8x128xf32>
    %24 = tpu.matmul %16, %9, %cst_19 {dimension_numbers = #tpu.dot_dimension_numbers<[1], [0], [0], [1], [0, 0, 1, 1], [], []>} : vector<8x128xf32>, vector<128x128xf32>, vector<8x128xf32> -> vector<8x128xf32>
    %25 = arith.addf %23, %24 : vector<8x128xf32>
    %26 = math.tanh %25 : vector<8x128xf32>
    %27 = arith.index_cast %c1_i32 : i32 to index
    %c0_20 = arith.constant 0 : index
    %c0_21 = arith.constant 0 : index
    %28 = vector.load %arg11[%27, %c0_20, %c0_21] : memref<8x8x128xf32, #tpu.memory_space<vmem>>, vector<1x8x128xf32>
    %29 = vector.shape_cast %28 : vector<1x8x128xf32> to vector<8x128xf32>
    %30 = vector.shape_cast %26 : vector<8x128xf32> to vector<1x8x128xf32>
    tpu.vector_store %arg11[%27, %c0_20, %c0_21], %30 {strides = array<i32>} : memref<8x8x128xf32, #tpu.memory_space<vmem>>, vector<1x8x128xf32>,
    %c2_i32 = arith.constant 2 : i32
    %31 = arith.index_cast %c2_i32 : i32 to index
    %c0_22 = arith.constant 0 : index
    %c0_23 = arith.constant 0 : index
    %32 = vector.load %arg10[%31, %c0_22, %c0_23] : memref<8x8x128xf32, #tpu.memory_space<vmem>>, vector<1x8x128xf32>
    %33 = vector.shape_cast %32 : vector<1x8x128xf32> to vector<8x128xf32>
    %cst_24 = arith.constant dense<0.000000e+00> : vector<8x128xf32>
    %34 = tpu.matmul %26, %9, %cst_24 {dimension_numbers = #tpu.dot_dimension_numbers<[1], [0], [0], [1], [0, 0, 1, 1], [], []>} : vector<8x128xf32>, vector<128x128xf32>, vector<8x128xf32> -> vector<8x128xf32>
    %35 = arith.addf %33, %34 : vector<8x128xf32>
    %36 = math.tanh %35 : vector<8x128xf32>
    %37 = arith.index_cast %c2_i32 : i32 to index
    %c0_25 = arith.constant 0 : index
    %c0_26 = arith.constant 0 : index
    %38 = vector.load %arg11[%37, %c0_25, %c0_26] : memref<8x8x128xf32, #tpu.memory_space<vmem>>, vector<1x8x128xf32>
    %39 = vector.shape_cast %38 : vector<1x8x128xf32> to vector<8x128xf32>
    %40 = vector.shape_cast %36 : vector<8x128xf32> to vector<1x8x128xf32>
    tpu.vector_store %arg11[%37, %c0_25, %c0_26], %40 {strides = array<i32>} : memref<8x8x128xf32, #tpu.memory_space<vmem>>, vector<1x8x128xf32>,
    %c3_i32 = arith.constant 3 : i32
    %41 = arith.index_cast %c3_i32 : i32 to index
    %c0_27 = arith.constant 0 : index
    %c0_28 = arith.constant 0 : index
    %42 = vector.load %arg10[%41, %c0_27, %c0_28] : memref<8x8x128xf32, #tpu.memory_space<vmem>>, vector<1x8x128xf32>
    %43 = vector.shape_cast %42 : vector<1x8x128xf32> to vector<8x128xf32>
    %cst_29 = arith.constant dense<0.000000e+00> : vector<8x128xf32>
    %44 = tpu.matmul %36, %9, %cst_29 {dimension_numbers = #tpu.dot_dimension_numbers<[1], [0], [0], [1], [0, 0, 1, 1], [], []>} : vector<8x128xf32>, vector<128x128xf32>, vector<8x128xf32> -> vector<8x128xf32>
    %45 = arith.addf %43, %44 : vector<8x128xf32>
    %46 = math.tanh %45 : vector<8x128xf32>
    %47 = arith.index_cast %c3_i32 : i32 to index
    %c0_30 = arith.constant 0 : index
    %c0_31 = arith.constant 0 : index
    %48 = vector.load %arg11[%47, %c0_30, %c0_31] : memref<8x8x128xf32, #tpu.memory_space<vmem>>, vector<1x8x128xf32>
    %49 = vector.shape_cast %48 : vector<1x8x128xf32> to vector<8x128xf32>
    %50 = vector.shape_cast %46 : vector<8x128xf32> to vector<1x8x128xf32>
    tpu.vector_store %arg11[%47, %c0_30, %c0_31], %50 {strides = array<i32>} : memref<8x8x128xf32, #tpu.memory_space<vmem>>, vector<1x8x128xf32>,
    %c4_i32 = arith.constant 4 : i32
    %51 = arith.index_cast %c4_i32 : i32 to index
    %c0_32 = arith.constant 0 : index
    %c0_33 = arith.constant 0 : index
    %52 = vector.load %arg10[%51, %c0_32, %c0_33] : memref<8x8x128xf32, #tpu.memory_space<vmem>>, vector<1x8x128xf32>
    %53 = vector.shape_cast %52 : vector<1x8x128xf32> to vector<8x128xf32>
    %cst_34 = arith.constant dense<0.000000e+00> : vector<8x128xf32>
    %54 = tpu.matmul %46, %9, %cst_34 {dimension_numbers = #tpu.dot_dimension_numbers<[1], [0], [0], [1], [0, 0, 1, 1], [], []>} : vector<8x128xf32>, vector<128x128xf32>, vector<8x128xf32> -> vector<8x128xf32>
    %55 = arith.addf %53, %54 : vector<8x128xf32>
    %56 = math.tanh %55 : vector<8x128xf32>
    %57 = arith.index_cast %c4_i32 : i32 to index
    %c0_35 = arith.constant 0 : index
    %c0_36 = arith.constant 0 : index
    %58 = vector.load %arg11[%57, %c0_35, %c0_36] : memref<8x8x128xf32, #tpu.memory_space<vmem>>, vector<1x8x128xf32>
    %59 = vector.shape_cast %58 : vector<1x8x128xf32> to vector<8x128xf32>
    %60 = vector.shape_cast %56 : vector<8x128xf32> to vector<1x8x128xf32>
    tpu.vector_store %arg11[%57, %c0_35, %c0_36], %60 {strides = array<i32>} : memref<8x8x128xf32, #tpu.memory_space<vmem>>, vector<1x8x128xf32>,
    %c5_i32 = arith.constant 5 : i32
    %61 = arith.index_cast %c5_i32 : i32 to index
    %c0_37 = arith.constant 0 : index
    %c0_38 = arith.constant 0 : index
    %62 = vector.load %arg10[%61, %c0_37, %c0_38] : memref<8x8x128xf32, #tpu.memory_space<vmem>>, vector<1x8x128xf32>
    %63 = vector.shape_cast %62 : vector<1x8x128xf32> to vector<8x128xf32>
    %cst_39 = arith.constant dense<0.000000e+00> : vector<8x128xf32>
    %64 = tpu.matmul %56, %9, %cst_39 {dimension_numbers = #tpu.dot_dimension_numbers<[1], [0], [0], [1], [0, 0, 1, 1], [], []>} : vector<8x128xf32>, vector<128x128xf32>, vector<8x128xf32> -> vector<8x128xf32>
    %65 = arith.addf %63, %64 : vector<8x128xf32>
    %66 = math.tanh %65 : vector<8x128xf32>
    %67 = arith.index_cast %c5_i32 : i32 to index
    %c0_40 = arith.constant 0 : index
    %c0_41 = arith.constant 0 : index
    %68 = vector.load %arg11[%67, %c0_40, %c0_41] : memref<8x8x128xf32, #tpu.memory_space<vmem>>, vector<1x8x128xf32>
    %69 = vector.shape_cast %68 : vector<1x8x128xf32> to vector<8x128xf32>
    %70 = vector.shape_cast %66 : vector<8x128xf32> to vector<1x8x128xf32>
    tpu.vector_store %arg11[%67, %c0_40, %c0_41], %70 {strides = array<i32>} : memref<8x8x128xf32, #tpu.memory_space<vmem>>, vector<1x8x128xf32>,
    %c6_i32 = arith.constant 6 : i32
    %71 = arith.index_cast %c6_i32 : i32 to index
    %c0_42 = arith.constant 0 : index
    %c0_43 = arith.constant 0 : index
    %72 = vector.load %arg10[%71, %c0_42, %c0_43] : memref<8x8x128xf32, #tpu.memory_space<vmem>>, vector<1x8x128xf32>
    %73 = vector.shape_cast %72 : vector<1x8x128xf32> to vector<8x128xf32>
    %cst_44 = arith.constant dense<0.000000e+00> : vector<8x128xf32>
    %74 = tpu.matmul %66, %9, %cst_44 {dimension_numbers = #tpu.dot_dimension_numbers<[1], [0], [0], [1], [0, 0, 1, 1], [], []>} : vector<8x128xf32>, vector<128x128xf32>, vector<8x128xf32> -> vector<8x128xf32>
    %75 = arith.addf %73, %74 : vector<8x128xf32>
    %76 = math.tanh %75 : vector<8x128xf32>
    %77 = arith.index_cast %c6_i32 : i32 to index
    %c0_45 = arith.constant 0 : index
    %c0_46 = arith.constant 0 : index
    %78 = vector.load %arg11[%77, %c0_45, %c0_46] : memref<8x8x128xf32, #tpu.memory_space<vmem>>, vector<1x8x128xf32>
    %79 = vector.shape_cast %78 : vector<1x8x128xf32> to vector<8x128xf32>
    %80 = vector.shape_cast %76 : vector<8x128xf32> to vector<1x8x128xf32>
    tpu.vector_store %arg11[%77, %c0_45, %c0_46], %80 {strides = array<i32>} : memref<8x8x128xf32, #tpu.memory_space<vmem>>, vector<1x8x128xf32>,
    %c7_i32 = arith.constant 7 : i32
    %81 = arith.index_cast %c7_i32 : i32 to index
    %c0_47 = arith.constant 0 : index
    %c0_48 = arith.constant 0 : index
    %82 = vector.load %arg10[%81, %c0_47, %c0_48] : memref<8x8x128xf32, #tpu.memory_space<vmem>>, vector<1x8x128xf32>
    %83 = vector.shape_cast %82 : vector<1x8x128xf32> to vector<8x128xf32>
    %cst_49 = arith.constant dense<0.000000e+00> : vector<8x128xf32>
    %84 = tpu.matmul %76, %9, %cst_49 {dimension_numbers = #tpu.dot_dimension_numbers<[1], [0], [0], [1], [0, 0, 1, 1], [], []>} : vector<8x128xf32>, vector<128x128xf32>, vector<8x128xf32> -> vector<8x128xf32>
    %85 = arith.addf %83, %84 : vector<8x128xf32>
    %86 = math.tanh %85 : vector<8x128xf32>
    %87 = arith.index_cast %c7_i32 : i32 to index
    %c0_50 = arith.constant 0 : index
    %c0_51 = arith.constant 0 : index
    %88 = vector.load %arg11[%87, %c0_50, %c0_51] : memref<8x8x128xf32, #tpu.memory_space<vmem>>, vector<1x8x128xf32>
    %89 = vector.shape_cast %88 : vector<1x8x128xf32> to vector<8x128xf32>
    %90 = vector.shape_cast %86 : vector<8x128xf32> to vector<1x8x128xf32>
    tpu.vector_store %arg11[%87, %c0_50, %c0_51], %90 {strides = array<i32>} : memref<8x8x128xf32, #tpu.memory_space<vmem>>, vector<1x8x128xf32>,
    %c8_i32 = arith.constant 8 : i32
    %c0_52 = arith.constant 0 : index
    %c0_53 = arith.constant 0 : index
    %c0_54 = arith.constant 0 : index
    %91 = vector.load %arg11[%c0_52, %c0_53, %c0_54] : memref<8x8x128xf32, #tpu.memory_space<vmem>>, vector<8x8x128xf32>
    %92 = vector.shape_cast %91 : vector<8x8x128xf32> to vector<64x128xf32>
    %c0_55 = arith.constant 0 : index
    %c0_56 = arith.constant 0 : index
    %93 = vector.load %arg5[%c0_55, %c0_56] : memref<128x128xf32, #tpu.memory_space<vmem>>, vector<128x128xf32>
    %cst_57 = arith.constant dense<0.000000e+00> : vector<64x128xf32>
    %94 = tpu.matmul %92, %93, %cst_57 {dimension_numbers = #tpu.dot_dimension_numbers<[1], [0], [0], [1], [0, 0, 1, 1], [], []>} : vector<64x128xf32>, vector<128x128xf32>, vector<64x128xf32> -> vector<64x128xf32>
    %c0_58 = arith.constant 0 : index
    %c0_59 = arith.constant 0 : index
    %95 = vector.load %arg7[%c0_58, %c0_59] : memref<1x128xf32, #tpu.memory_space<vmem>>, vector<1x128xf32>
    %96 = vector.broadcast %95 : vector<1x128xf32> to vector<64x128xf32>
    %97 = arith.addf %94, %96 : vector<64x128xf32>
    %98 = vector.shape_cast %97 : vector<64x128xf32> to vector<8x8x128xf32>
    %c0_60 = arith.constant 0 : index
    %c0_61 = arith.constant 0 : index
    %c0_62 = arith.constant 0 : index
    %99 = vector.load %arg10[%c0_60, %c0_61, %c0_62] : memref<8x8x128xf32, #tpu.memory_space<vmem>>, vector<8x8x128xf32>
    tpu.vector_store %arg10[%c0_60, %c0_61, %c0_62], %98 {strides = array<i32>} : memref<8x8x128xf32, #tpu.memory_space<vmem>>, vector<8x8x128xf32>,
    %c0_63 = arith.constant 0 : index
    %c0_64 = arith.constant 0 : index
    %100 = vector.load %arg6[%c0_63, %c0_64] : memref<128x128xf32, #tpu.memory_space<vmem>>, vector<128x128xf32>
    %cst_65 = arith.constant 0.000000e+00 : f32
    %101 = vector.broadcast %cst_65 : f32 to vector<8x128xf32>
    %c0_i32_66 = arith.constant 0 : i32
    %102 = arith.index_cast %c0_i32_66 : i32 to index
    %c0_67 = arith.constant 0 : index
    %c0_68 = arith.constant 0 : index
    %103 = vector.load %arg10[%102, %c0_67, %c0_68] : memref<8x8x128xf32, #tpu.memory_space<vmem>>, vector<1x8x128xf32>
    %104 = vector.shape_cast %103 : vector<1x8x128xf32> to vector<8x128xf32>
    %cst_69 = arith.constant dense<0.000000e+00> : vector<8x128xf32>
    %105 = tpu.matmul %101, %100, %cst_69 {dimension_numbers = #tpu.dot_dimension_numbers<[1], [0], [0], [1], [0, 0, 1, 1], [], []>} : vector<8x128xf32>, vector<128x128xf32>, vector<8x128xf32> -> vector<8x128xf32>
    %106 = arith.addf %104, %105 : vector<8x128xf32>
    %107 = math.tanh %106 : vector<8x128xf32>
    %108 = arith.index_cast %c0_i32_66 : i32 to index
    %c0_70 = arith.constant 0 : index
    %c0_71 = arith.constant 0 : index
    %109 = vector.load %arg11[%108, %c0_70, %c0_71] : memref<8x8x128xf32, #tpu.memory_space<vmem>>, vector<1x8x128xf32>
    %110 = vector.shape_cast %109 : vector<1x8x128xf32> to vector<8x128xf32>
    %111 = vector.shape_cast %107 : vector<8x128xf32> to vector<1x8x128xf32>
    tpu.vector_store %arg11[%108, %c0_70, %c0_71], %111 {strides = array<i32>} : memref<8x8x128xf32, #tpu.memory_space<vmem>>, vector<1x8x128xf32>,
    %c1_i32_72 = arith.constant 1 : i32
    %112 = arith.index_cast %c1_i32_72 : i32 to index
    %c0_73 = arith.constant 0 : index
    %c0_74 = arith.constant 0 : index
    %113 = vector.load %arg10[%112, %c0_73, %c0_74] : memref<8x8x128xf32, #tpu.memory_space<vmem>>, vector<1x8x128xf32>
    %114 = vector.shape_cast %113 : vector<1x8x128xf32> to vector<8x128xf32>
    %cst_75 = arith.constant dense<0.000000e+00> : vector<8x128xf32>
    %115 = tpu.matmul %107, %100, %cst_75 {dimension_numbers = #tpu.dot_dimension_numbers<[1], [0], [0], [1], [0, 0, 1, 1], [], []>} : vector<8x128xf32>, vector<128x128xf32>, vector<8x128xf32> -> vector<8x128xf32>
    %116 = arith.addf %114, %115 : vector<8x128xf32>
    %117 = math.tanh %116 : vector<8x128xf32>
    %118 = arith.index_cast %c1_i32_72 : i32 to index
    %c0_76 = arith.constant 0 : index
    %c0_77 = arith.constant 0 : index
    %119 = vector.load %arg11[%118, %c0_76, %c0_77] : memref<8x8x128xf32, #tpu.memory_space<vmem>>, vector<1x8x128xf32>
    %120 = vector.shape_cast %119 : vector<1x8x128xf32> to vector<8x128xf32>
    %121 = vector.shape_cast %117 : vector<8x128xf32> to vector<1x8x128xf32>
    tpu.vector_store %arg11[%118, %c0_76, %c0_77], %121 {strides = array<i32>} : memref<8x8x128xf32, #tpu.memory_space<vmem>>, vector<1x8x128xf32>,
    %c2_i32_78 = arith.constant 2 : i32
    %122 = arith.index_cast %c2_i32_78 : i32 to index
    %c0_79 = arith.constant 0 : index
    %c0_80 = arith.constant 0 : index
    %123 = vector.load %arg10[%122, %c0_79, %c0_80] : memref<8x8x128xf32, #tpu.memory_space<vmem>>, vector<1x8x128xf32>
    %124 = vector.shape_cast %123 : vector<1x8x128xf32> to vector<8x128xf32>
    %cst_81 = arith.constant dense<0.000000e+00> : vector<8x128xf32>
    %125 = tpu.matmul %117, %100, %cst_81 {dimension_numbers = #tpu.dot_dimension_numbers<[1], [0], [0], [1], [0, 0, 1, 1], [], []>} : vector<8x128xf32>, vector<128x128xf32>, vector<8x128xf32> -> vector<8x128xf32>
    %126 = arith.addf %124, %125 : vector<8x128xf32>
    %127 = math.tanh %126 : vector<8x128xf32>
    %128 = arith.index_cast %c2_i32_78 : i32 to index
    %c0_82 = arith.constant 0 : index
    %c0_83 = arith.constant 0 : index
    %129 = vector.load %arg11[%128, %c0_82, %c0_83] : memref<8x8x128xf32, #tpu.memory_space<vmem>>, vector<1x8x128xf32>
    %130 = vector.shape_cast %129 : vector<1x8x128xf32> to vector<8x128xf32>
    %131 = vector.shape_cast %127 : vector<8x128xf32> to vector<1x8x128xf32>
    tpu.vector_store %arg11[%128, %c0_82, %c0_83], %131 {strides = array<i32>} : memref<8x8x128xf32, #tpu.memory_space<vmem>>, vector<1x8x128xf32>,
    %c3_i32_84 = arith.constant 3 : i32
    %132 = arith.index_cast %c3_i32_84 : i32 to index
    %c0_85 = arith.constant 0 : index
    %c0_86 = arith.constant 0 : index
    %133 = vector.load %arg10[%132, %c0_85, %c0_86] : memref<8x8x128xf32, #tpu.memory_space<vmem>>, vector<1x8x128xf32>
    %134 = vector.shape_cast %133 : vector<1x8x128xf32> to vector<8x128xf32>
    %cst_87 = arith.constant dense<0.000000e+00> : vector<8x128xf32>
    %135 = tpu.matmul %127, %100, %cst_87 {dimension_numbers = #tpu.dot_dimension_numbers<[1], [0], [0], [1], [0, 0, 1, 1], [], []>} : vector<8x128xf32>, vector<128x128xf32>, vector<8x128xf32> -> vector<8x128xf32>
    %136 = arith.addf %134, %135 : vector<8x128xf32>
    %137 = math.tanh %136 : vector<8x128xf32>
    %138 = arith.index_cast %c3_i32_84 : i32 to index
    %c0_88 = arith.constant 0 : index
    %c0_89 = arith.constant 0 : index
    %139 = vector.load %arg11[%138, %c0_88, %c0_89] : memref<8x8x128xf32, #tpu.memory_space<vmem>>, vector<1x8x128xf32>
    %140 = vector.shape_cast %139 : vector<1x8x128xf32> to vector<8x128xf32>
    %141 = vector.shape_cast %137 : vector<8x128xf32> to vector<1x8x128xf32>
    tpu.vector_store %arg11[%138, %c0_88, %c0_89], %141 {strides = array<i32>} : memref<8x8x128xf32, #tpu.memory_space<vmem>>, vector<1x8x128xf32>,
    %c4_i32_90 = arith.constant 4 : i32
    %142 = arith.index_cast %c4_i32_90 : i32 to index
    %c0_91 = arith.constant 0 : index
    %c0_92 = arith.constant 0 : index
    %143 = vector.load %arg10[%142, %c0_91, %c0_92] : memref<8x8x128xf32, #tpu.memory_space<vmem>>, vector<1x8x128xf32>
    %144 = vector.shape_cast %143 : vector<1x8x128xf32> to vector<8x128xf32>
    %cst_93 = arith.constant dense<0.000000e+00> : vector<8x128xf32>
    %145 = tpu.matmul %137, %100, %cst_93 {dimension_numbers = #tpu.dot_dimension_numbers<[1], [0], [0], [1], [0, 0, 1, 1], [], []>} : vector<8x128xf32>, vector<128x128xf32>, vector<8x128xf32> -> vector<8x128xf32>
    %146 = arith.addf %144, %145 : vector<8x128xf32>
    %147 = math.tanh %146 : vector<8x128xf32>
    %148 = arith.index_cast %c4_i32_90 : i32 to index
    %c0_94 = arith.constant 0 : index
    %c0_95 = arith.constant 0 : index
    %149 = vector.load %arg11[%148, %c0_94, %c0_95] : memref<8x8x128xf32, #tpu.memory_space<vmem>>, vector<1x8x128xf32>
    %150 = vector.shape_cast %149 : vector<1x8x128xf32> to vector<8x128xf32>
    %151 = vector.shape_cast %147 : vector<8x128xf32> to vector<1x8x128xf32>
    tpu.vector_store %arg11[%148, %c0_94, %c0_95], %151 {strides = array<i32>} : memref<8x8x128xf32, #tpu.memory_space<vmem>>, vector<1x8x128xf32>,
    %c5_i32_96 = arith.constant 5 : i32
    %152 = arith.index_cast %c5_i32_96 : i32 to index
    %c0_97 = arith.constant 0 : index
    %c0_98 = arith.constant 0 : index
    %153 = vector.load %arg10[%152, %c0_97, %c0_98] : memref<8x8x128xf32, #tpu.memory_space<vmem>>, vector<1x8x128xf32>
    %154 = vector.shape_cast %153 : vector<1x8x128xf32> to vector<8x128xf32>
    %cst_99 = arith.constant dense<0.000000e+00> : vector<8x128xf32>
    %155 = tpu.matmul %147, %100, %cst_99 {dimension_numbers = #tpu.dot_dimension_numbers<[1], [0], [0], [1], [0, 0, 1, 1], [], []>} : vector<8x128xf32>, vector<128x128xf32>, vector<8x128xf32> -> vector<8x128xf32>
    %156 = arith.addf %154, %155 : vector<8x128xf32>
    %157 = math.tanh %156 : vector<8x128xf32>
    %158 = arith.index_cast %c5_i32_96 : i32 to index
    %c0_100 = arith.constant 0 : index
    %c0_101 = arith.constant 0 : index
    %159 = vector.load %arg11[%158, %c0_100, %c0_101] : memref<8x8x128xf32, #tpu.memory_space<vmem>>, vector<1x8x128xf32>
    %160 = vector.shape_cast %159 : vector<1x8x128xf32> to vector<8x128xf32>
    %161 = vector.shape_cast %157 : vector<8x128xf32> to vector<1x8x128xf32>
    tpu.vector_store %arg11[%158, %c0_100, %c0_101], %161 {strides = array<i32>} : memref<8x8x128xf32, #tpu.memory_space<vmem>>, vector<1x8x128xf32>,
    %c6_i32_102 = arith.constant 6 : i32
    %162 = arith.index_cast %c6_i32_102 : i32 to index
    %c0_103 = arith.constant 0 : index
    %c0_104 = arith.constant 0 : index
    %163 = vector.load %arg10[%162, %c0_103, %c0_104] : memref<8x8x128xf32, #tpu.memory_space<vmem>>, vector<1x8x128xf32>
    %164 = vector.shape_cast %163 : vector<1x8x128xf32> to vector<8x128xf32>
    %cst_105 = arith.constant dense<0.000000e+00> : vector<8x128xf32>
    %165 = tpu.matmul %157, %100, %cst_105 {dimension_numbers = #tpu.dot_dimension_numbers<[1], [0], [0], [1], [0, 0, 1, 1], [], []>} : vector<8x128xf32>, vector<128x128xf32>, vector<8x128xf32> -> vector<8x128xf32>
    %166 = arith.addf %164, %165 : vector<8x128xf32>
    %167 = math.tanh %166 : vector<8x128xf32>
    %168 = arith.index_cast %c6_i32_102 : i32 to index
    %c0_106 = arith.constant 0 : index
    %c0_107 = arith.constant 0 : index
    %169 = vector.load %arg11[%168, %c0_106, %c0_107] : memref<8x8x128xf32, #tpu.memory_space<vmem>>, vector<1x8x128xf32>
    %170 = vector.shape_cast %169 : vector<1x8x128xf32> to vector<8x128xf32>
    %171 = vector.shape_cast %167 : vector<8x128xf32> to vector<1x8x128xf32>
    tpu.vector_store %arg11[%168, %c0_106, %c0_107], %171 {strides = array<i32>} : memref<8x8x128xf32, #tpu.memory_space<vmem>>, vector<1x8x128xf32>,
    %c7_i32_108 = arith.constant 7 : i32
    %172 = arith.index_cast %c7_i32_108 : i32 to index
    %c0_109 = arith.constant 0 : index
    %c0_110 = arith.constant 0 : index
    %173 = vector.load %arg10[%172, %c0_109, %c0_110] : memref<8x8x128xf32, #tpu.memory_space<vmem>>, vector<1x8x128xf32>
    %174 = vector.shape_cast %173 : vector<1x8x128xf32> to vector<8x128xf32>
    %cst_111 = arith.constant dense<0.000000e+00> : vector<8x128xf32>
    %175 = tpu.matmul %167, %100, %cst_111 {dimension_numbers = #tpu.dot_dimension_numbers<[1], [0], [0], [1], [0, 0, 1, 1], [], []>} : vector<8x128xf32>, vector<128x128xf32>, vector<8x128xf32> -> vector<8x128xf32>
    %176 = arith.addf %174, %175 : vector<8x128xf32>
    %177 = math.tanh %176 : vector<8x128xf32>
    %178 = arith.index_cast %c7_i32_108 : i32 to index
    %c0_112 = arith.constant 0 : index
    %c0_113 = arith.constant 0 : index
    %179 = vector.load %arg11[%178, %c0_112, %c0_113] : memref<8x8x128xf32, #tpu.memory_space<vmem>>, vector<1x8x128xf32>
    %180 = vector.shape_cast %179 : vector<1x8x128xf32> to vector<8x128xf32>
    %181 = vector.shape_cast %177 : vector<8x128xf32> to vector<1x8x128xf32>
    tpu.vector_store %arg11[%178, %c0_112, %c0_113], %181 {strides = array<i32>} : memref<8x8x128xf32, #tpu.memory_space<vmem>>, vector<1x8x128xf32>,
    %c8_i32_114 = arith.constant 8 : i32
    %c0_115 = arith.constant 0 : index
    %c0_116 = arith.constant 0 : index
    %c0_117 = arith.constant 0 : index
    %182 = vector.load %arg11[%c0_115, %c0_116, %c0_117] : memref<8x8x128xf32, #tpu.memory_space<vmem>>, vector<8x8x128xf32>
    %183 = vector.shape_cast %182 : vector<8x8x128xf32> to vector<64x128xf32>
    %c0_118 = arith.constant 0 : index
    %c0_119 = arith.constant 0 : index
    %184 = vector.load %arg8[%c0_118, %c0_119] : memref<128x128xf32, #tpu.memory_space<vmem>>, vector<128x128xf32>
    %cst_120 = arith.constant dense<0.000000e+00> : vector<64x128xf32>
    %185 = tpu.matmul %183, %184, %cst_120 {dimension_numbers = #tpu.dot_dimension_numbers<[1], [0], [0], [1], [0, 0, 1, 1], [], []>} : vector<64x128xf32>, vector<128x128xf32>, vector<64x128xf32> -> vector<64x128xf32>
    %c0_121 = arith.constant 0 : index
    %c0_122 = arith.constant 0 : index
    %186 = vector.load %arg9[%c0_121, %c0_122] : memref<1x128xf32, #tpu.memory_space<vmem>>, vector<1x128xf32>
    %187 = vector.broadcast %186 : vector<1x128xf32> to vector<64x128xf32>
    %188 = arith.addf %185, %187 : vector<64x128xf32>
    %189 = vector.shape_cast %188 : vector<64x128xf32> to vector<8x8x128xf32>
    %c0_123 = arith.constant 0 : index
    %c0_124 = arith.constant 0 : index
    %c0_125 = arith.constant 0 : index
    %190 = vector.load %arg10[%c0_123, %c0_124, %c0_125] : memref<8x8x128xf32, #tpu.memory_space<vmem>>, vector<8x8x128xf32>
    tpu.vector_store %arg10[%c0_123, %c0_124, %c0_125], %189 {strides = array<i32>} : memref<8x8x128xf32, #tpu.memory_space<vmem>>, vector<8x8x128xf32>,
    return
  }
  func.func @transform_0(%arg0: i32) -> (i32, i32, i32) {
    %c0_i32 = arith.constant 0 : i32
    %c0_i32_0 = arith.constant 0 : i32
    %c0_i32_1 = arith.constant 0 : i32
    return %c0_i32, %arg0, %c0_i32_0 : i32, i32, i32
  }
  func.func @transform_1(%arg0: i32) -> (i32, i32) {
    %c0_i32 = arith.constant 0 : i32
    %c0_i32_0 = arith.constant 0 : i32
    %c0_i32_1 = arith.constant 0 : i32
    return %c0_i32, %c0_i32_0 : i32, i32
  }
  func.func @transform_2(%arg0: i32) -> (i32, i32) {
    %c0_i32 = arith.constant 0 : i32
    %c0_i32_0 = arith.constant 0 : i32
    %c0_i32_1 = arith.constant 0 : i32
    return %c0_i32, %c0_i32_0 : i32, i32
  }
  func.func @transform_3(%arg0: i32) -> (i32, i32) {
    %c0_i32 = arith.constant 0 : i32
    %c0_i32_0 = arith.constant 0 : i32
    %c0_i32_1 = arith.constant 0 : i32
    return %c0_i32, %c0_i32_0 : i32, i32
  }
  func.func @transform_4(%arg0: i32) -> (i32, i32) {
    %c0_i32 = arith.constant 0 : i32
    %c0_i32_0 = arith.constant 0 : i32
    %c0_i32_1 = arith.constant 0 : i32
    return %c0_i32, %c0_i32_0 : i32, i32
  }
  func.func @transform_5(%arg0: i32) -> (i32, i32) {
    %c0_i32 = arith.constant 0 : i32
    %c0_i32_0 = arith.constant 0 : i32
    %c0_i32_1 = arith.constant 0 : i32
    return %c0_i32, %c0_i32_0 : i32, i32
  }
  func.func @transform_6(%arg0: i32) -> (i32, i32) {
    %c0_i32 = arith.constant 0 : i32
    %c0_i32_0 = arith.constant 0 : i32
    %c0_i32_1 = arith.constant 0 : i32
    return %c0_i32, %c0_i32_0 : i32, i32
  }
  func.func @transform_7(%arg0: i32) -> (i32, i32) {
    %c0_i32 = arith.constant 0 : i32
    %c0_i32_0 = arith.constant 0 : i32
    %c0_i32_1 = arith.constant 0 : i32
    return %c0_i32, %c0_i32_0 : i32, i32
  }
  func.func @transform_8(%arg0: i32) -> (i32, i32) {
    %c0_i32 = arith.constant 0 : i32
    %c0_i32_0 = arith.constant 0 : i32
    %c0_i32_1 = arith.constant 0 : i32
    return %c0_i32, %c0_i32_0 : i32, i32
  }
  func.func @transform_9(%arg0: i32) -> (i32, i32, i32) {
    %c0_i32 = arith.constant 0 : i32
    %c0_i32_0 = arith.constant 0 : i32
    %c0_i32_1 = arith.constant 0 : i32
    return %c0_i32, %arg0, %c0_i32_0 : i32, i32, i32
  }
}

</mosaic_0001>

<bundles_post_ra>
// kernel: tpu_custom_call.1
= control target key start
LH: loop header
LB: loop body
LE: loop exit
PB: predicated region body
PF: predicated region fallthrough
CT: control target
= control target key end

     0   :  { %14 = vsyncpa [#allocation4], 0  ;;  %s1530_s0 = inlined_call_operand.hbm [shape: f32[8,8,128], index: 0, kind: input, shape index: {}]   ;;  %s1531_s1 = inlined_call_operand.hbm [shape: f32[128,128], index: 1, kind: input, shape index: {}]   ;;  %s1532_s2 = inlined_call_operand.hbm [shape: f32[128,128], index: 2, kind: input, shape index: {}]   ;;  %s1533_s3 = inlined_call_operand.vmem [shape: f32[1,128], index: 3, kind: input, shape index: {}]   ;;  %s1534_s4 = inlined_call_operand.hbm [shape: f32[128,128], index: 4, kind: input, shape index: {}]   ;;  %s1535_s5 = inlined_call_operand.hbm [shape: f32[128,128], index: 5, kind: input, shape index: {}]   ;;  %s1536_s6 = inlined_call_operand.vmem [shape: f32[1,128], index: 6, kind: input, shape index: {}]   ;;  %s1537_s7 = inlined_call_operand.hbm [shape: f32[128,128], index: 7, kind: input, shape index: {}]   ;;  %s1538_s8 = inlined_call_operand.vmem [shape: f32[1,128], index: 8, kind: input, shape index: {}]   ;;  %s1539_s9 = inlined_call_operand.hbm [shape: f32[8,8,128], index: 9, kind: output, shape index: {}]  }
   0x1   :  { %15 = vsyncpa [#allocation7], 0 }
   0x2   :  { %16 = vsyncpa [#allocation10], 0 }
   0x3   :  { %17 = vsyncpa [#allocation13], 0 }
   0x4   :  { %18 = vsyncpa [#allocation5], 0  ;;  %s36_s11 = sshll.u32 %s1531_s1, 4  ;;  %s1049_s12 = smov [#allocation6]   ;;  %s37_s11 = int_to_ptr.hbm [resolvable:$true] %s36_s11 }
   0x5   :  { %s38_s13 = sshll.u32 %s1049_s12, 4  ;;  %s64_s16 = sshll.u32 %s1534_s4, 4  ;;  %s39_s13 = int_to_ptr.vmem [resolvable:$true] %s38_s13  ;;  %s65_s16 = int_to_ptr.hbm [resolvable:$true] %s64_s16 }
   0x6   :  { %s1050_s17 = smov 128   ;;  %s1051_s18 = smov 8  }
   0x7   :  { %44 = dma.hbm_to_vmem [thread:$0]  %s37_s11, 2048, %s39_s13, [#allocation7], %s1050_s17, %s1050_s17, %s1051_s18  }
   0x8   :  { %s1052_s19 = smov [#allocation9]   ;;  %s23_s1 = sshll.u32 %s1530_s0, 4  ;;  %s24_s1 = int_to_ptr.hbm [resolvable:$true] %s23_s1 }
   0x9   :  { %s66_s20 = sshll.u32 %s1052_s19, 4  ;;  %s49_s24 = sshll.u32 %s1532_s2, 4  ;;  %s67_s20 = int_to_ptr.vmem [resolvable:$true] %s66_s20  ;;  %s50_s24 = int_to_ptr.hbm [resolvable:$true] %s49_s24 }
   0xa   :  { %72 = dma.hbm_to_vmem [thread:$0]  %s65_s16, 2048, %s67_s20, [#allocation10], %s1050_s17, %s1050_s17, %s1051_s18  }
   0xb   :  { %s1053_s25 = smov [#allocation3]   ;;  %s1054_s27 = smov [#allocation8]  }
   0xc   :  { %s25_s26 = sshll.u32 %s1053_s25, 4  ;;  %s51_s0 = sshll.u32 %s1054_s27, 4  ;;  %s26_s26 = int_to_ptr.vmem [resolvable:$true] %s25_s26  ;;  %s52_s0 = int_to_ptr.vmem [resolvable:$true] %s51_s0 }
   0xd   :  { %31 = dma.hbm_to_vmem [thread:$0]  %s24_s1, 1024, %s26_s26, [#allocation4], %s1050_s17, %s1050_s17, %s1051_s18  }
   0xe   :  { %s77_s30 = sshll.u32 %s1535_s5, 4  ;;  %s92_s11 = sshll.u32 %s1537_s7, 4  ;;  %s78_s30 = int_to_ptr.hbm [resolvable:$true] %s77_s30  ;;  %s93_s11 = int_to_ptr.hbm [resolvable:$true] %s92_s11 }
   0xf   :  { %57 = dma.hbm_to_vmem [thread:$0]  %s50_s24, 2048, %s52_s0, [#allocation7], %s1050_s17, %s1050_s17, %s1051_s18  }
  0x10   :  { %s1055_s12 = smov [#allocation11]   ;;  %s1056_s14 = smov [#allocation12]  }
  0x11   :  { %s79_s13 = sshll.u32 %s1055_s12, 4  ;;  %s94_s5 = sshll.u32 %s1056_s14, 4  ;;  %s80_s13 = int_to_ptr.vmem [resolvable:$true] %s79_s13  ;;  %s95_s5 = int_to_ptr.vmem [resolvable:$true] %s94_s5 }
  0x12   :  { %85 = dma.hbm_to_vmem [thread:$0]  %s78_s30, 2048, %s80_s13, [#allocation10], %s1050_s17, %s1050_s17, %s1051_s18  }
  0x13   :  { %100 = dma.hbm_to_vmem [thread:$0]  %s93_s11, 2048, %s95_s5, [#allocation13], %s1050_s17, %s1050_s17, %s1051_s18  }
  0x14   :  { %1039 = dma.done.wait [#allocation4], 1024  }
  0x15   :  { %1040 = vsyncadd [#allocation4], 4294966272 }
  0x16   :  { %1041 = dma.done.wait [#allocation7], 4096  }
  0x17   :  { %1042 = vsyncadd [#allocation7], 4294963200 }
  0x18   :  { %1043 = dma.done.wait [#allocation10], 4096  }
  0x19   :  { %1044 = vsyncadd [#allocation10], 4294963200 }
  0x1a   :  { %1045 = dma.done.wait [#allocation13], 2048  }
  0x1b   :  { %1046 = vsyncadd [#allocation13], 4294965248  ;;  %v150_v0 = vld [vmem:[#allocation6 + $0x78] sm:$0xff]  ;;  %v149_v1 = vld [vmem:[#allocation6 + $0x70] sm:$0xff]  ;;  %v1057_v36 = vmov 0.0   ;;  %s794_s1 = sshll.u32 %s1539_s9, 4  ;;  %s795_s1 = int_to_ptr.hbm [resolvable:$true] %s794_s1 }
  0x1c   :  { %155 = vmatpush.msra.mxu1 %v150_v0  ;;  %810 = vmatpush.msra.mxu2 %v150_v0  ;;  %v148_v2 = vld [vmem:[#allocation6 + $0x68] sm:$0xff]  ;;  %v147_v3 = vld [vmem:[#allocation6 + $0x60] sm:$0xff]  ;;  %v1145_v4 = vld [vmem:[#allocation8 + $0x78] sm:$0xff] }
  0x1d   :  { %v146_v5 = vld [vmem:[#allocation6 + $0x58] sm:$0xff]  ;;  %272 = vmatpush.msra.mxu3 %v1145_v4  ;;  %376 = vmatpush.msra.mxu0 %v1145_v4  ;;  %v1149_v6 = vld [vmem:[#allocation8 + $0x70] sm:$0xff]  ;;  %v1153_v8 = vld [vmem:[#allocation8 + $0x68] sm:$0xff] }
  0x1e   :  { %156 = vmatpush.msra.mxu1 %v149_v1  ;;  %811 = vmatpush.msra.mxu2 %v149_v1  ;;  %v145_v7 = vld [vmem:[#allocation6 + $0x50] sm:$0xff]  ;;  %v144_v9 = vld [vmem:[#allocation6 + $0x48] sm:$0xff]  ;;  %v1157_v10 = vld [vmem:[#allocation8 + $0x60] sm:$0xff] }
  0x1f   :  { %273 = vmatpush.msra.mxu3 %v1149_v6  ;;  %377 = vmatpush.msra.mxu0 %v1149_v6  ;;  %v143_v11 = vld [vmem:[#allocation6 + $0x40] sm:$0xff]  ;;  %v1161_v12 = vld [vmem:[#allocation8 + $0x58] sm:$0xff]  ;;  %v1165_v14 = vld [vmem:[#allocation8 + $0x50] sm:$0xff] }
  0x20   :  { %157 = vmatpush.msra.mxu1 %v148_v2  ;;  %812 = vmatpush.msra.mxu2 %v148_v2  ;;  %v142_v13 = vld [vmem:[#allocation6 + $0x38] sm:$0xff]  ;;  %v141_v15 = vld [vmem:[#allocation6 + $0x30] sm:$0xff]  ;;  %v1169_v16 = vld [vmem:[#allocation8 + $0x48] sm:$0xff] }
  0x21   :  { %274 = vmatpush.msra.mxu3 %v1153_v8  ;;  %378 = vmatpush.msra.mxu0 %v1153_v8  ;;  %v140_v17 = vld [vmem:[#allocation6 + $0x28] sm:$0xff]  ;;  %v1173_v18 = vld [vmem:[#allocation8 + $0x40] sm:$0xff]  ;;  %v1177_v20 = vld [vmem:[#allocation8 + $0x38] sm:$0xff] }
  0x22   :  { %158 = vmatpush.msra.mxu1 %v147_v3  ;;  %813 = vmatpush.msra.mxu2 %v147_v3  ;;  %v139_v19 = vld [vmem:[#allocation6 + $0x20] sm:$0xff]  ;;  %v138_v21 = vld [vmem:[#allocation6 + $0x18] sm:$0xff]  ;;  %v1181_v22 = vld [vmem:[#allocation8 + $0x30] sm:$0xff] }
  0x23   :  { %275 = vmatpush.msra.mxu3 %v1157_v10  ;;  %379 = vmatpush.msra.mxu0 %v1157_v10  ;;  %v137_v23 = vld [vmem:[#allocation6 + $0x10] sm:$0xff]  ;;  %v1185_v24 = vld [vmem:[#allocation8 + $0x28] sm:$0xff]  ;;  %v1189_v26 = vld [vmem:[#allocation8 + $0x20] sm:$0xff] }
  0x24   :  { %159 = vmatpush.msra.mxu1 %v146_v5  ;;  %814 = vmatpush.msra.mxu2 %v146_v5  ;;  %v136_v25 = vld [vmem:[#allocation6 + $0x8] sm:$0xff]  ;;  %v135_v27 = vld [vmem:[#allocation6] sm:$0xff]  ;;  %v1193_v29 = vld [vmem:[#allocation8 + $0x18] sm:$0xff] }
  0x25   :  { %276 = vmatpush.msra.mxu3 %v1161_v12  ;;  %380 = vmatpush.msra.mxu0 %v1161_v12  ;;  %v127_v28 = vld [vmem:[#allocation3] sm:$0xff]  ;;  %v1197_v30 = vld [vmem:[#allocation8 + $0x10] sm:$0xff]  ;;  %v1202_v31 = vld [vmem:[#allocation8 + $0x8] sm:$0xff] }
  0x26   :  { %160 = vmatpush.msra.mxu1 %v145_v7  ;;  %815 = vmatpush.msra.mxu2 %v145_v7  ;;  %v1208_v32 = vld [vmem:[#allocation8] sm:$0xff]  ;;  %v128_v33 = vld [vmem:[#allocation3 + $0x8] sm:$0xff]  ;;  %v129_v34 = vld [vmem:[#allocation3 + $0x10] sm:$0xff] }
  0x27   :  { %277 = vmatpush.msra.mxu3 %v1165_v14  ;;  %381 = vmatpush.msra.mxu0 %v1165_v14  ;;  %v130_v35 = vld [vmem:[#allocation3 + $0x18] sm:$0xff]  ;;  %v131_v37 = vld [vmem:[#allocation3 + $0x20] sm:$0xff]  ;;  %v132_v38 = vld [vmem:[#allocation3 + $0x28] sm:$0xff] }
  0x28   :  { %161 = vmatpush.msra.mxu1 %v144_v9  ;;  %816 = vmatpush.msra.mxu2 %v144_v9  ;;  %v133_v39 = vld [vmem:[#allocation3 + $0x30] sm:$0xff]  ;;  %v134_v41 = vld [vmem:[#allocation3 + $0x38] sm:$0xff]  ;;  %v1309_v45 = vld [vmem:[%s1533_s3] ss:$0 sm:$0xff] }
  0x29   :  { %278 = vmatpush.msra.mxu3 %v1169_v16  ;;  %382 = vmatpush.msra.mxu0 %v1169_v16  ;;  %v449_v58 = vld [vmem:[#allocation9 + $0x78] sm:$0xff]  ;;  %v448_v59 = vld [vmem:[#allocation9 + $0x70] sm:$0xff]  ;;  %v447_v60 = vld [vmem:[#allocation9 + $0x68] sm:$0xff] }
  0x2a   :  { %162 = vmatpush.msra.mxu1 %v143_v11  ;;  %817 = vmatpush.msra.mxu2 %v143_v11  ;;  %v446_v61 = vld [vmem:[#allocation9 + $0x60] sm:$0xff]  ;;  %v445_v62 = vld [vmem:[#allocation9 + $0x58] sm:$0xff]  ;;  %v444_v63 = vld [vmem:[#allocation9 + $0x50] sm:$0xff] }
  0x2b   :  { %279 = vmatpush.msra.mxu3 %v1173_v18  ;;  %383 = vmatpush.msra.mxu0 %v1173_v18  ;;  %v443_v0 = vld [vmem:[#allocation9 + $0x48] sm:$0xff]  ;;  %v442_v5 = vld [vmem:[#allocation9 + $0x40] sm:$0xff]  ;;  %v440_v7 = vld [vmem:[#allocation9 + $0x30] sm:$0xff] }
  0x2c   :  { %163 = vmatpush.msra.mxu1 %v142_v13  ;;  %818 = vmatpush.msra.mxu2 %v142_v13  ;;  %v438_v9 = vld [vmem:[#allocation9 + $0x20] sm:$0xff]  ;;  %v436_v11 = vld [vmem:[#allocation9 + $0x10] sm:$0xff] }
  0x2d   :  { %280 = vmatpush.msra.mxu3 %v1177_v20  ;;  %384 = vmatpush.msra.mxu0 %v1177_v20  ;;  %v434_v13 = vld [vmem:[#allocation9] sm:$0xff] }
  0x2e   :  { %164 = vmatpush.msra.mxu1 %v141_v15  ;;  %819 = vmatpush.msra.mxu2 %v141_v15 }
  0x2f   :  { %281 = vmatpush.msra.mxu3 %v1181_v22  ;;  %385 = vmatpush.msra.mxu0 %v1181_v22 }
  0x30   :  { %165 = vmatpush.msra.mxu1 %v140_v17  ;;  %820 = vmatpush.msra.mxu2 %v140_v17 }
  0x31   :  { %282 = vmatpush.msra.mxu3 %v1185_v24  ;;  %386 = vmatpush.msra.mxu0 %v1185_v24 }
  0x32   :  { %166 = vmatpush.msra.mxu1 %v139_v19  ;;  %821 = vmatpush.msra.mxu2 %v139_v19  ;;  %v1331_v19 = vld [vmem:[#allocation11 + $0x70] sm:$0xff] }
  0x33   :  { %283 = vmatpush.msra.mxu3 %v1189_v26  ;;  %387 = vmatpush.msra.mxu0 %v1189_v26 }
  0x34   :  { %167 = vmatpush.msra.mxu1 %v138_v21  ;;  %822 = vmatpush.msra.mxu2 %v138_v21  ;;  %v1341_v21 = vld [vmem:[#allocation11 + $0x60] sm:$0xff] }
  0x35   :  { %284 = vmatpush.msra.mxu3 %v1193_v29  ;;  %388 = vmatpush.msra.mxu0 %v1193_v29 }
  0x36   :  { %168 = vmatpush.msra.mxu1 %v137_v23  ;;  %823 = vmatpush.msra.mxu2 %v137_v23  ;;  %v1354_v23 = vld [vmem:[#allocation11 + $0x50] sm:$0xff] }
  0x37   :  { %285 = vmatpush.msra.mxu3 %v1197_v30  ;;  %389 = vmatpush.msra.mxu0 %v1197_v30 }
  0x38   :  { %169 = vmatpush.msra.mxu1 %v136_v25  ;;  %824 = vmatpush.msra.mxu2 %v136_v25  ;;  %v1373_v25 = vld [vmem:[#allocation11 + $0x40] sm:$0xff] }
  0x39   :  { %286 = vmatpush.msra.mxu3 %v1202_v31  ;;  %390 = vmatpush.msra.mxu0 %v1202_v31 }
  0x3a   :  { %170 = vmatpush.msra.mxu1 %v135_v27  ;;  %825 = vmatpush.msra.mxu2 %v135_v27  ;;  %v1382_v27 = vld [vmem:[#allocation11 + $0x30] sm:$0xff] }
  0x3b   :  { %171 = vmatmul.f32.vlgmr.msra.gmra.mxu1 %v127_v28  ;;  %287 = vmatpush.msra.mxu3 %v1208_v32  ;;  %v1385_v28 = vld [vmem:[#allocation11 + $0x28] sm:$0xff] }
  0x3c   :  { %246 = vmatpush.msrb.mxu2 %v1145_v4  ;;  %221 = vmatpush.msrb.mxu1 %v1145_v4 }
  0x3d   :  { %350 = vmatpush.msrb.mxu3 %v1145_v4  ;;  %391 = vmatpush.msra.mxu0 %v1208_v32 }
  0x3e   :  { %247 = vmatpush.msrb.mxu2 %v1149_v6  ;;  %222 = vmatpush.msrb.mxu1 %v1149_v6 }
  0x3f   :  { %351 = vmatpush.msrb.mxu3 %v1149_v6  ;;  %183 = vmatmul.f32.vlgmr.msra.gmra.mxu2 %v131_v37 }
  0x40   :  { %248 = vmatpush.msrb.mxu2 %v1153_v8  ;;  %223 = vmatpush.msrb.mxu1 %v1153_v8 }
  0x41   :  { %352 = vmatpush.msrb.mxu3 %v1153_v8 }
  0x42   :  { %249 = vmatpush.msrb.mxu2 %v1157_v10  ;;  %224 = vmatpush.msrb.mxu1 %v1157_v10 }
  0x43   :  { %174 = vmatmul.f32.gmra.mxu1 %v128_v33  ;;  %353 = vmatpush.msrb.mxu3 %v1157_v10  ;;  %v1419_v33 = vld [vmem:[#allocation11] sm:$0xff] }
  0x44   :  { %250 = vmatpush.msrb.mxu2 %v1161_v12  ;;  %225 = vmatpush.msrb.mxu1 %v1161_v12 }
  0x45   :  { %354 = vmatpush.msrb.mxu3 %v1161_v12 }
  0x46   :  { %251 = vmatpush.msrb.mxu2 %v1165_v14  ;;  %226 = vmatpush.msrb.mxu1 %v1165_v14 }
  0x47   :  { %355 = vmatpush.msrb.mxu3 %v1165_v14  ;;  %186 = vmatmul.f32.gmra.mxu2 %v132_v38 }
  0x48   :  { %252 = vmatpush.msrb.mxu2 %v1169_v16  ;;  %227 = vmatpush.msrb.mxu1 %v1169_v16 }
  0x49   :  { %356 = vmatpush.msrb.mxu3 %v1169_v16 }
  0x4a   :  { %253 = vmatpush.msrb.mxu2 %v1173_v18  ;;  %228 = vmatpush.msrb.mxu1 %v1173_v18 }
  0x4b   :  { %177 = vmatmul.f32.gmra.mxu1 %v129_v34  ;;  %357 = vmatpush.msrb.mxu3 %v1173_v18 }
  0x4c   :  { %254 = vmatpush.msrb.mxu2 %v1177_v20  ;;  %229 = vmatpush.msrb.mxu1 %v1177_v20 }
  0x4d   :  { %358 = vmatpush.msrb.mxu3 %v1177_v20 }
  0x4e   :  { %255 = vmatpush.msrb.mxu2 %v1181_v22  ;;  %230 = vmatpush.msrb.mxu1 %v1181_v22 }
  0x4f   :  { %359 = vmatpush.msrb.mxu3 %v1181_v22  ;;  %189 = vmatmul.f32.gmra.mxu2 %v133_v39 }
  0x50   :  { %256 = vmatpush.msrb.mxu2 %v1185_v24  ;;  %231 = vmatpush.msrb.mxu1 %v1185_v24 }
  0x51   :  { %360 = vmatpush.msrb.mxu3 %v1185_v24 }
  0x52   :  { %257 = vmatpush.msrb.mxu2 %v1189_v26  ;;  %232 = vmatpush.msrb.mxu1 %v1189_v26 }
  0x53   :  { %180 = vmatmul.f32.gmra.mxu1 %v130_v35  ;;  %361 = vmatpush.msrb.mxu3 %v1189_v26 }
  0x54   :  { %258 = vmatpush.msrb.mxu2 %v1193_v29  ;;  %233 = vmatpush.msrb.mxu1 %v1193_v29 }
  0x55   :  { %362 = vmatpush.msrb.mxu3 %v1193_v29 }
  0x56   :  { %259 = vmatpush.msrb.mxu2 %v1197_v30  ;;  %234 = vmatpush.msrb.mxu1 %v1197_v30 }
  0x57   :  { %363 = vmatpush.msrb.mxu3 %v1197_v30  ;;  %192 = vmatmul.f32.gmra.mxu2 %v134_v41  ;;  %v1467_v41 = vld [vmem:[%s1536_s6] ss:$0 sm:$0xff] }
  0x58   :  { %260 = vmatpush.msrb.mxu2 %v1202_v31  ;;  %235 = vmatpush.msrb.mxu1 %v1202_v31 }
  0x59   :  { %364 = vmatpush.msrb.mxu3 %v1202_v31 }
  0x5a   :  { %261 = vmatpush.msrb.mxu2 %v1208_v32  ;;  %236 = vmatpush.msrb.mxu1 %v1208_v32 }
  0x5b   :  { %237 = vmatmul.f32.vlgmr.msrb.gmra.mxu1 %v1057_v36  ;;  %365 = vmatpush.msrb.mxu3 %v1208_v32 }
  0x5c   :  { %298 = vmatpush.msra.mxu1 %v1145_v4  ;;  %324 = vmatpush.msra.mxu2 %v1145_v4 }
  0x5e   :  { %299 = vmatpush.msra.mxu1 %v1149_v6  ;;  %325 = vmatpush.msra.mxu2 %v1149_v6 }
  0x60   :  { %300 = vmatpush.msra.mxu1 %v1153_v8  ;;  %326 = vmatpush.msra.mxu2 %v1153_v8 }
  0x62   :  { %301 = vmatpush.msra.mxu1 %v1157_v10  ;;  %327 = vmatpush.msra.mxu2 %v1157_v10 }
  0x64   :  { %302 = vmatpush.msra.mxu1 %v1161_v12  ;;  %328 = vmatpush.msra.mxu2 %v1161_v12 }
  0x66   :  { %303 = vmatpush.msra.mxu1 %v1165_v14  ;;  %329 = vmatpush.msra.mxu2 %v1165_v14 }
  0x68   :  { %304 = vmatpush.msra.mxu1 %v1169_v16  ;;  %330 = vmatpush.msra.mxu2 %v1169_v16 }
  0x6a   :  { %305 = vmatpush.msra.mxu1 %v1173_v18  ;;  %331 = vmatpush.msra.mxu2 %v1173_v18 }
  0x6c   :  { %306 = vmatpush.msra.mxu1 %v1177_v20  ;;  %332 = vmatpush.msra.mxu2 %v1177_v20 }
  0x6e   :  { %307 = vmatpush.msra.mxu1 %v1181_v22  ;;  %333 = vmatpush.msra.mxu2 %v1181_v22 }
  0x70   :  { %308 = vmatpush.msra.mxu1 %v1185_v24  ;;  %334 = vmatpush.msra.mxu2 %v1185_v24 }
  0x72   :  { %309 = vmatpush.msra.mxu1 %v1189_v26  ;;  %335 = vmatpush.msra.mxu2 %v1189_v26 }
  0x74   :  { %310 = vmatpush.msra.mxu1 %v1193_v29  ;;  %336 = vmatpush.msra.mxu2 %v1193_v29 }
  0x76   :  { %311 = vmatpush.msra.mxu1 %v1197_v30  ;;  %337 = vmatpush.msra.mxu2 %v1197_v30 }
  0x78   :  { %312 = vmatpush.msra.mxu1 %v1202_v31  ;;  %338 = vmatpush.msra.mxu2 %v1202_v31 }
  0x7a   :  { %313 = vmatpush.msra.mxu1 %v1208_v32  ;;  %339 = vmatpush.msra.mxu2 %v1208_v32 }
  0x7c   :  { %402 = vmatpush.msrb.mxu1 %v1145_v4 }
  0x7e   :  { %403 = vmatpush.msrb.mxu1 %v1149_v6  ;;  %v441_v6 = vld [vmem:[#allocation9 + $0x38] sm:$0xff] }
  0x80   :  { %404 = vmatpush.msrb.mxu1 %v1153_v8  ;;  %v439_v8 = vld [vmem:[#allocation9 + $0x28] sm:$0xff] }
  0x82   :  { %405 = vmatpush.msrb.mxu1 %v1157_v10  ;;  %v437_v10 = vld [vmem:[#allocation9 + $0x18] sm:$0xff] }
  0x84   :  { %406 = vmatpush.msrb.mxu1 %v1161_v12  ;;  %v435_v12 = vld [vmem:[#allocation9 + $0x8] sm:$0xff] }
  0x86   :  { %407 = vmatpush.msrb.mxu1 %v1165_v14 }
  0x88   :  { %408 = vmatpush.msrb.mxu1 %v1169_v16 }
  0x8a   :  { %409 = vmatpush.msrb.mxu1 %v1173_v18  ;;  %v1329_v18 = vld [vmem:[#allocation11 + $0x78] sm:$0xff] }
  0x8b   :  { %544 = vmatpush.msrb.mxu0 %v1329_v18 }
  0x8c   :  { %410 = vmatpush.msrb.mxu1 %v1177_v20  ;;  %v1335_v20 = vld [vmem:[#allocation11 + $0x68] sm:$0xff] }
  0x8d   :  { %545 = vmatpush.msrb.mxu0 %v1331_v19 }
  0x8e   :  { %411 = vmatpush.msrb.mxu1 %v1181_v22  ;;  %v1347_v22 = vld [vmem:[#allocation11 + $0x58] sm:$0xff] }
  0x8f   :  { %546 = vmatpush.msrb.mxu0 %v1335_v20 }
  0x90   :  { %412 = vmatpush.msrb.mxu1 %v1185_v24  ;;  %v1359_v24 = vld [vmem:[#allocation11 + $0x48] sm:$0xff] }
  0x91   :  { %547 = vmatpush.msrb.mxu0 %v1341_v21 }
  0x92   :  { %413 = vmatpush.msrb.mxu1 %v1189_v26  ;;  %v1377_v26 = vld [vmem:[#allocation11 + $0x38] sm:$0xff] }
  0x93   :  { %548 = vmatpush.msrb.mxu0 %v1347_v22 }
  0x94   :  { %414 = vmatpush.msrb.mxu1 %v1193_v29  ;;  %v1395_v29 = vld [vmem:[#allocation11 + $0x20] sm:$0xff] }
  0x95   :  { %549 = vmatpush.msrb.mxu0 %v1354_v23 }
  0x96   :  { %415 = vmatpush.msrb.mxu1 %v1197_v30  ;;  %v1401_v30 = vld [vmem:[#allocation11 + $0x18] sm:$0xff] }
  0x97   :  { %550 = vmatpush.msrb.mxu0 %v1359_v24 }
  0x98   :  { %416 = vmatpush.msrb.mxu1 %v1202_v31  ;;  %v1403_v31 = vld [vmem:[#allocation11 + $0x10] sm:$0xff] }
  0x99   :  { %551 = vmatpush.msrb.mxu0 %v1373_v25 }
  0x9a   :  { %417 = vmatpush.msrb.mxu1 %v1208_v32  ;;  %v1409_v32 = vld [vmem:[#allocation11 + $0x8] sm:$0xff] }
  0x9b   :  { %552 = vmatpush.msrb.mxu0 %v1377_v26 }
  0x9d   :  { %553 = vmatpush.msrb.mxu0 %v1382_v27 }
  0x9f   :  { %554 = vmatpush.msrb.mxu0 %v1385_v28 }
  0xa1   :  { %555 = vmatpush.msrb.mxu0 %v1395_v29 }
  0xa3   :  { %556 = vmatpush.msrb.mxu0 %v1401_v30 }
  0xa5   :  { %557 = vmatpush.msrb.mxu0 %v1403_v31 }
  0xa7   :  { %558 = vmatpush.msrb.mxu0 %v1409_v32 }
  0xa9   :  { %559 = vmatpush.msrb.mxu0 %v1419_v33 }
  0xb8   :  { %v172_v40 = vpop.f32.mrf.mxu1 }
  0xb9   :  { %v173_v46 = vadd.f32 %v1309_v45, %v172_v40 }
  0xc0   :  { %v175_v42 = vpop.f32.mrf.mxu1 }
  0xc1   :  { %v176_v54 = vadd.f32 %v1309_v45, %v175_v42 }
  0xc2   :  { %v1315_v50 = vpop.f32.mrf.mxu2 }
  0xc3   :  { %v185_v34 = vadd.f32 %v1309_v45, %v1315_v50 }
  0xc8   :  { %v178_v43 = vpop.f32.mrf.mxu1 }
  0xc9   :  { %v179_v1 = vadd.f32 %v1309_v45, %v178_v43 }
  0xca   :  { %v1317_v51 = vpop.f32.mrf.mxu2 }
  0xd0   :  { %v181_v44 = vpop.f32.mrf.mxu1 }
  0xd1   :  { %v182_v14 = vadd.f32 %v1309_v45, %v181_v44 }
  0xd2   :  { %v1319_v52 = vpop.f32.mrf.mxu2 }
  0xd8   :  { %v238_v47 = vpop.f32.mrf.mxu1 }
  0xd9   :  { %v241_v48 = vadd.f32 %v238_v47, %v173_v46 }
  0xda   :  { %v1321_v53 = vpop.f32.mrf.mxu2 }
  0xdb   :  { %839 = vtanh.f32 %v241_v48 }
  0xe1   :  { %v1312_v49 = vpop.eup %839 }
  0xe2   :  { %262 = vmatmul.f32.vlgmr.msrb.gmra.mxu2 %v1312_v49 }
  0xe3   :  { %454 = vmatpush.msrb.mxu2 %v449_v58 }
  0xe5   :  { %455 = vmatpush.msrb.mxu2 %v448_v59 }
  0xe7   :  { %456 = vmatpush.msrb.mxu2 %v447_v60  ;;  %v733_v60 = vld [vmem:[#allocation12 + $0x70] sm:$0xff] }
  0xe9   :  { %457 = vmatpush.msrb.mxu2 %v446_v61  ;;  %v732_v61 = vld [vmem:[#allocation12 + $0x68] sm:$0xff] }
  0xeb   :  { %458 = vmatpush.msrb.mxu2 %v445_v62  ;;  %v194_v62 = vadd.f32 %v1309_v45, %v1321_v53  ;;  %v726_v53 = vld [vmem:[#allocation12 + $0x38] sm:$0xff] }
  0xed   :  { %459 = vmatpush.msrb.mxu2 %v444_v63 }
  0xef   :  { %460 = vmatpush.msrb.mxu2 %v443_v0 }
  0xf1   :  { %461 = vmatpush.msrb.mxu2 %v442_v5 }
  0xf3   :  { %462 = vmatpush.msrb.mxu2 %v441_v6 }
  0xf5   :  { %463 = vmatpush.msrb.mxu2 %v440_v7  ;;  %v731_v7 = vld [vmem:[#allocation12 + $0x60] sm:$0xff] }
  0xf7   :  { %464 = vmatpush.msrb.mxu2 %v439_v8  ;;  %v730_v8 = vld [vmem:[#allocation12 + $0x58] sm:$0xff] }
  0xf9   :  { %465 = vmatpush.msrb.mxu2 %v438_v9  ;;  %v729_v9 = vld [vmem:[#allocation12 + $0x50] sm:$0xff] }
  0xfb   :  { %466 = vmatpush.msrb.mxu2 %v437_v10  ;;  %v728_v10 = vld [vmem:[#allocation12 + $0x48] sm:$0xff] }
  0xfd   :  { %467 = vmatpush.msrb.mxu2 %v436_v11  ;;  %v725_v11 = vld [vmem:[#allocation12 + $0x30] sm:$0xff] }
  0xff   :  { %468 = vmatpush.msrb.mxu2 %v435_v12  ;;  %v724_v12 = vld [vmem:[#allocation12 + $0x28] sm:$0xff] }
 0x101   :  { %469 = vmatpush.msrb.mxu2 %v434_v13  ;;  %v723_v13 = vld [vmem:[#allocation12 + $0x20] sm:$0xff] }
 0x165   :  { %v263_v55 = vpop.f32.mrf.mxu2 }
 0x166   :  { %v266_v56 = vadd.f32 %v263_v55, %v176_v54 }
 0x168   :  { %841 = vtanh.f32 %v266_v56 }
 0x16e   :  { %v1324_v57 = vpop.eup %841 }
 0x16f   :  { %288 = vmatmul.f32.vlgmr.msra.gmra.mxu3 %v1324_v57 }
 0x170   :  { %520 = vmatpush.msra.mxu3 %v1329_v18 }
 0x172   :  { %521 = vmatpush.msra.mxu3 %v1331_v19 }
 0x174   :  { %522 = vmatpush.msra.mxu3 %v1335_v20 }
 0x176   :  { %523 = vmatpush.msra.mxu3 %v1341_v21 }
 0x178   :  { %524 = vmatpush.msra.mxu3 %v1347_v22 }
 0x17a   :  { %525 = vmatpush.msra.mxu3 %v1354_v23 }
 0x17c   :  { %526 = vmatpush.msra.mxu3 %v1359_v24 }
 0x17e   :  { %527 = vmatpush.msra.mxu3 %v1373_v25 }
 0x180   :  { %528 = vmatpush.msra.mxu3 %v1377_v26 }
 0x182   :  { %529 = vmatpush.msra.mxu3 %v1382_v27 }
 0x184   :  { %530 = vmatpush.msra.mxu3 %v1385_v28 }
 0x186   :  { %531 = vmatpush.msra.mxu3 %v1395_v29 }
 0x188   :  { %532 = vmatpush.msra.mxu3 %v1401_v30 }
 0x18a   :  { %533 = vmatpush.msra.mxu3 %v1403_v31 }
 0x18c   :  { %534 = vmatpush.msra.mxu3 %v1409_v32 }
 0x18e   :  { %535 = vmatpush.msra.mxu3 %v1419_v33 }
 0x1f2   :  { %v289_v2 = vpop.f32.mrf.mxu3 }
 0x1f3   :  { %v292_v3 = vadd.f32 %v289_v2, %v179_v1 }
 0x1f5   :  { %843 = vtanh.f32 %v292_v3 }
 0x1fb   :  { %v844_v4 = vpop.eup %843 }
 0x1fc   :  { %314 = vmatmul.f32.vlgmr.msra.gmra.mxu1 %v844_v4 }
 0x1fd   :  { %568 = vmatpush.msra.mxu1 %v1329_v18 }
 0x1ff   :  { %569 = vmatpush.msra.mxu1 %v1331_v19 }
 0x201   :  { %570 = vmatpush.msra.mxu1 %v1335_v20 }
 0x203   :  { %571 = vmatpush.msra.mxu1 %v1341_v21 }
 0x205   :  { %572 = vmatpush.msra.mxu1 %v1347_v22 }
 0x207   :  { %573 = vmatpush.msra.mxu1 %v1354_v23 }
 0x209   :  { %574 = vmatpush.msra.mxu1 %v1359_v24 }
 0x20b   :  { %575 = vmatpush.msra.mxu1 %v1373_v25 }
 0x20d   :  { %576 = vmatpush.msra.mxu1 %v1377_v26 }
 0x20f   :  { %577 = vmatpush.msra.mxu1 %v1382_v27 }
 0x211   :  { %578 = vmatpush.msra.mxu1 %v1385_v28 }
 0x213   :  { %579 = vmatpush.msra.mxu1 %v1395_v29 }
 0x215   :  { %580 = vmatpush.msra.mxu1 %v1401_v30 }
 0x217   :  { %581 = vmatpush.msra.mxu1 %v1403_v31 }
 0x219   :  { %582 = vmatpush.msra.mxu1 %v1409_v32 }
 0x21b   :  { %583 = vmatpush.msra.mxu1 %v1419_v33 }
 0x279   :  { %v315_v15 = vpop.f32.mrf.mxu1 }
 0x27a   :  { %v318_v16 = vadd.f32 %v315_v15, %v182_v14  ;;  %v722_v14 = vld [vmem:[#allocation12 + $0x18] sm:$0xff]  ;;  %v721_v15 = vld [vmem:[#allocation12 + $0x10] sm:$0xff] }
 0x27c   :  { %845 = vtanh.f32 %v318_v16  ;;  %v720_v16 = vld [vmem:[#allocation12 + $0x8] sm:$0xff] }
 0x282   :  { %v846_v17 = vpop.eup %845 }
 0x283   :  { %340 = vmatmul.f32.vlgmr.msra.gmra.mxu2 %v846_v17 }
 0x284   :  { %664 = vmatpush.msra.mxu2 %v1329_v18 }
 0x286   :  { %665 = vmatpush.msra.mxu2 %v1331_v19 }
 0x288   :  { %666 = vmatpush.msra.mxu2 %v1335_v20 }
 0x28a   :  { %667 = vmatpush.msra.mxu2 %v1341_v21 }
 0x28b   :  { %470 = vmatmul.f32.vlgmr.msrb.gmra.mxu2 %v1312_v49  ;;  %v191_v49 = vadd.f32 %v1309_v45, %v1319_v52  ;;  %v734_v52 = vld [vmem:[#allocation12 + $0x78] sm:$0xff] }
 0x28c   :  { %668 = vmatpush.msra.mxu2 %v1347_v22 }
 0x28e   :  { %669 = vmatpush.msra.mxu2 %v1354_v23 }
 0x290   :  { %670 = vmatpush.msra.mxu2 %v1359_v24 }
 0x292   :  { %671 = vmatpush.msra.mxu2 %v1373_v25 }
 0x293   :  { %473 = vmatmul.f32.gmra.mxu2 %v1324_v57 }
 0x294   :  { %672 = vmatpush.msra.mxu2 %v1377_v26 }
 0x296   :  { %673 = vmatpush.msra.mxu2 %v1382_v27 }
 0x298   :  { %674 = vmatpush.msra.mxu2 %v1385_v28 }
 0x29a   :  { %675 = vmatpush.msra.mxu2 %v1395_v29 }
 0x29b   :  { %476 = vmatmul.f32.gmra.mxu2 %v844_v4 }
 0x29c   :  { %676 = vmatpush.msra.mxu2 %v1401_v30 }
 0x29e   :  { %677 = vmatpush.msra.mxu2 %v1403_v31 }
 0x2a0   :  { %678 = vmatpush.msra.mxu2 %v1409_v32 }
 0x2a2   :  { %679 = vmatpush.msra.mxu2 %v1419_v33 }
 0x2a3   :  { %479 = vmatmul.f32.gmra.mxu2 %v846_v17  ;;  %v719_v17 = vld [vmem:[#allocation12] sm:$0xff] }
 0x306   :  { %v341_v35 = vpop.f32.mrf.mxu2 }
 0x307   :  { %v344_v37 = vadd.f32 %v341_v35, %v185_v34 }
 0x309   :  { %847 = vtanh.f32 %v344_v37 }
 0x30e   :  { %v471_v42 = vpop.f32.mrf.mxu2 }
 0x30f   :  { %v848_v38 = vpop.eup %847  ;;  %v472_v43 = vadd.f32 %v1467_v41, %v471_v42 }
 0x310   :  { %366 = vmatmul.f32.vlgmr.msrb.gmra.mxu3 %v848_v38  ;;  %482 = vmatmul.f32.gmra.mxu2 %v848_v38 }
 0x311   :  { %592 = vmatpush.msrb.mxu3 %v1329_v18 }
 0x313   :  { %593 = vmatpush.msrb.mxu3 %v1331_v19 }
 0x315   :  { %594 = vmatpush.msrb.mxu3 %v1335_v20 }
 0x316   :  { %v474_v54 = vpop.f32.mrf.mxu2 }
 0x317   :  { %595 = vmatpush.msrb.mxu3 %v1341_v21  ;;  %v475_v55 = vadd.f32 %v1467_v41, %v474_v54 }
 0x318   :  { %536 = vmatmul.f32.vlgmr.msra.gmra.mxu3 %v1057_v36  ;;  %v188_v36 = vadd.f32 %v1309_v45, %v1317_v51  ;;  %v727_v45 = vld [vmem:[#allocation12 + $0x40] sm:$0xff] }
 0x319   :  { %596 = vmatpush.msrb.mxu3 %v1347_v22 }
 0x31b   :  { %597 = vmatpush.msrb.mxu3 %v1354_v23 }
 0x31d   :  { %598 = vmatpush.msrb.mxu3 %v1359_v24 }
 0x31e   :  { %v477_v1 = vpop.f32.mrf.mxu2 }
 0x31f   :  { %599 = vmatpush.msrb.mxu3 %v1373_v25  ;;  %v478_v2 = vadd.f32 %v1467_v41, %v477_v1 }
 0x321   :  { %600 = vmatpush.msrb.mxu3 %v1377_v26 }
 0x323   :  { %601 = vmatpush.msrb.mxu3 %v1382_v27 }
 0x325   :  { %602 = vmatpush.msrb.mxu3 %v1385_v28 }
 0x327   :  { %603 = vmatpush.msrb.mxu3 %v1395_v29 }
 0x329   :  { %604 = vmatpush.msrb.mxu3 %v1401_v30 }
 0x32b   :  { %605 = vmatpush.msrb.mxu3 %v1403_v31 }
 0x32d   :  { %606 = vmatpush.msrb.mxu3 %v1409_v32 }
 0x32f   :  { %607 = vmatpush.msrb.mxu3 %v1419_v33 }
 0x331   :  { %688 = vmatpush.msra.mxu3 %v1329_v18 }
 0x333   :  { %689 = vmatpush.msra.mxu3 %v1331_v19 }
 0x335   :  { %690 = vmatpush.msra.mxu3 %v1335_v20 }
 0x337   :  { %691 = vmatpush.msra.mxu3 %v1341_v21 }
 0x339   :  { %692 = vmatpush.msra.mxu3 %v1347_v22 }
 0x33b   :  { %693 = vmatpush.msra.mxu3 %v1354_v23 }
 0x33d   :  { %694 = vmatpush.msra.mxu3 %v1359_v24 }
 0x33f   :  { %695 = vmatpush.msra.mxu3 %v1373_v25 }
 0x341   :  { %696 = vmatpush.msra.mxu3 %v1377_v26 }
 0x343   :  { %697 = vmatpush.msra.mxu3 %v1382_v27 }
 0x345   :  { %698 = vmatpush.msra.mxu3 %v1385_v28 }
 0x347   :  { %699 = vmatpush.msra.mxu3 %v1395_v29 }
 0x349   :  { %700 = vmatpush.msra.mxu3 %v1401_v30 }
 0x34b   :  { %701 = vmatpush.msra.mxu3 %v1403_v31 }
 0x34d   :  { %702 = vmatpush.msra.mxu3 %v1409_v32 }
 0x34f   :  { %703 = vmatpush.msra.mxu3 %v1419_v33 }
 0x393   :  { %v367_v39 = vpop.f32.mrf.mxu3 }
 0x394   :  { %v370_v40 = vadd.f32 %v367_v39, %v188_v36 }
 0x396   :  { %849 = vtanh.f32 %v370_v40 }
 0x39b   :  { %v537_v44 = vpop.f32.mrf.mxu3 }
 0x39c   :  { %v850_v46 = vpop.eup %849  ;;  %v540_v47 = vadd.f32 %v537_v44, %v472_v43 }
 0x39d   :  { %392 = vmatmul.f32.vlgmr.msra.gmra.mxu0 %v850_v46  ;;  %485 = vmatmul.f32.gmra.mxu2 %v850_v46 }
 0x39e   :  { %851 = vtanh.f32 %v540_v47  ;;  %616 = vmatpush.msra.mxu0 %v1329_v18 }
 0x3a0   :  { %617 = vmatpush.msra.mxu0 %v1331_v19 }
 0x3a2   :  { %618 = vmatpush.msra.mxu0 %v1335_v20 }
 0x3a4   :  { %v1473_v48 = vpop.eup %851  ;;  %619 = vmatpush.msra.mxu0 %v1341_v21 }
 0x3a5   :  { %560 = vmatmul.f32.vlgmr.msrb.gmra.mxu0 %v1473_v48 }
 0x3a6   :  { %620 = vmatpush.msra.mxu0 %v1347_v22 }
 0x3a8   :  { %621 = vmatpush.msra.mxu0 %v1354_v23 }
 0x3aa   :  { %622 = vmatpush.msra.mxu0 %v1359_v24 }
 0x3ac   :  { %623 = vmatpush.msra.mxu0 %v1373_v25 }
 0x3ae   :  { %624 = vmatpush.msra.mxu0 %v1377_v26 }
 0x3b0   :  { %625 = vmatpush.msra.mxu0 %v1382_v27 }
 0x3b2   :  { %626 = vmatpush.msra.mxu0 %v1385_v28 }
 0x3b4   :  { %627 = vmatpush.msra.mxu0 %v1395_v29 }
 0x3b6   :  { %628 = vmatpush.msra.mxu0 %v1401_v30 }
 0x3b8   :  { %629 = vmatpush.msra.mxu0 %v1403_v31 }
 0x3ba   :  { %630 = vmatpush.msra.mxu0 %v1409_v32 }
 0x3bc   :  { %631 = vmatpush.msra.mxu0 %v1419_v33 }
 0x3be   :  { %739 = vmatpush.msrb.mxu0 %v734_v52 }
 0x3c0   :  { %740 = vmatpush.msrb.mxu0 %v733_v60 }
 0x3c2   :  { %741 = vmatpush.msrb.mxu0 %v732_v61 }
 0x3c4   :  { %742 = vmatpush.msrb.mxu0 %v731_v7 }
 0x3c6   :  { %743 = vmatpush.msrb.mxu0 %v730_v8 }
 0x3c8   :  { %744 = vmatpush.msrb.mxu0 %v729_v9 }
 0x3ca   :  { %745 = vmatpush.msrb.mxu0 %v728_v10 }
 0x3cc   :  { %746 = vmatpush.msrb.mxu0 %v727_v45 }
 0x3ce   :  { %747 = vmatpush.msrb.mxu0 %v726_v53 }
 0x3d0   :  { %748 = vmatpush.msrb.mxu0 %v725_v11 }
 0x3d2   :  { %749 = vmatpush.msrb.mxu0 %v724_v12 }
 0x3d4   :  { %750 = vmatpush.msrb.mxu0 %v723_v13 }
 0x3d6   :  { %751 = vmatpush.msrb.mxu0 %v722_v14 }
 0x3d8   :  { %752 = vmatpush.msrb.mxu0 %v721_v15 }
 0x3da   :  { %753 = vmatpush.msrb.mxu0 %v720_v16 }
 0x3dc   :  { %754 = vmatpush.msrb.mxu0 %v719_v17 }
 0x41a   :  { %v393_v50 = vpop.f32.mrf.mxu0 }
 0x41b   :  { %v396_v51 = vadd.f32 %v393_v50, %v191_v49 }
 0x41d   :  { %853 = vtanh.f32 %v396_v51 }
 0x422   :  { %v561_v56 = vpop.f32.mrf.mxu0 }
 0x423   :  { %v854_v57 = vpop.eup %853  ;;  %v564_v58 = vadd.f32 %v561_v56, %v475_v55 }
 0x424   :  { %418 = vmatmul.f32.vlgmr.msrb.gmra.mxu1 %v854_v57  ;;  %488 = vmatmul.f32.gmra.mxu2 %v854_v57 }
 0x425   :  { %855 = vtanh.f32 %v564_v58  ;;  %640 = vmatpush.msrb.mxu1 %v1329_v18  ;;  %v480_v18 = vpop.f32.mrf.mxu2 }
 0x427   :  { %641 = vmatpush.msrb.mxu1 %v1331_v19  ;;  %v481_v19 = vadd.f32 %v1467_v41, %v480_v18 }
 0x429   :  { %642 = vmatpush.msrb.mxu1 %v1335_v20 }
 0x42b   :  { %v1495_v59 = vpop.eup %855  ;;  %643 = vmatpush.msrb.mxu1 %v1341_v21 }
 0x42c   :  { %584 = vmatmul.f32.vlgmr.msra.gmra.mxu1 %v1495_v59 }
 0x42d   :  { %644 = vmatpush.msrb.mxu1 %v1347_v22 }
 0x42f   :  { %645 = vmatpush.msrb.mxu1 %v1354_v23  ;;  %v483_v23 = vpop.f32.mrf.mxu2 }
 0x431   :  { %646 = vmatpush.msrb.mxu1 %v1359_v24  ;;  %v484_v24 = vadd.f32 %v1467_v41, %v483_v23 }
 0x433   :  { %647 = vmatpush.msrb.mxu1 %v1373_v25 }
 0x435   :  { %648 = vmatpush.msrb.mxu1 %v1377_v26 }
 0x437   :  { %649 = vmatpush.msrb.mxu1 %v1382_v27  ;;  %v838_v27 = vld [vmem:[%s1538_s8] ss:$0 sm:$0xff]  ;;  %v486_v38 = vpop.f32.mrf.mxu2  ;;  %s1058_s8 = smov [#allocation14]  }
 0x438   :  { %v487_v36 = vadd.f32 %v1467_v41, %v486_v38  ;;  %s792_s20 = sshll.u32 %s1058_s8, 4  ;;  %s793_s20 = int_to_ptr.vmem [resolvable:$true] %s792_s20 }
 0x439   :  { %650 = vmatpush.msrb.mxu1 %v1385_v28 }
 0x43b   :  { %651 = vmatpush.msrb.mxu1 %v1395_v29 }
 0x43d   :  { %652 = vmatpush.msrb.mxu1 %v1401_v30 }
 0x43f   :  { %653 = vmatpush.msrb.mxu1 %v1403_v31 }
 0x441   :  { %654 = vmatpush.msrb.mxu1 %v1409_v32 }
 0x443   :  { %655 = vmatpush.msrb.mxu1 %v1419_v33 }
 0x4a1   :  { %v419_v63 = vpop.f32.mrf.mxu1 }
 0x4a2   :  { %v422_v0 = vadd.f32 %v419_v63, %v194_v62 }
 0x4a4   :  { %857 = vtanh.f32 %v422_v0 }
 0x4a7   :  { %v489_v46 = vpop.f32.mrf.mxu2 }
 0x4a8   :  { %v490_v50 = vadd.f32 %v1467_v41, %v489_v46 }
 0x4a9   :  { %v585_v3 = vpop.f32.mrf.mxu1 }
 0x4aa   :  { %v858_v4 = vpop.eup %857  ;;  %v588_v5 = vadd.f32 %v585_v3, %v478_v2 }
 0x4ab   :  { %491 = vmatmul.f32.gmra.mxu2 %v858_v4 }
 0x4ac   :  { %859 = vtanh.f32 %v588_v5 }
 0x4b2   :  { %v860_v6 = vpop.eup %859 }
 0x4b3   :  { %608 = vmatmul.f32.vlgmr.msrb.gmra.mxu3 %v860_v6 }
 0x52e   :  { %v492_v47 = vpop.f32.mrf.mxu2 }
 0x52f   :  { %v493_v58 = vadd.f32 %v1467_v41, %v492_v47 }
 0x536   :  { %v609_v20 = vpop.f32.mrf.mxu3 }
 0x537   :  { %v612_v21 = vadd.f32 %v609_v20, %v481_v19 }
 0x539   :  { %861 = vtanh.f32 %v612_v21 }
 0x53f   :  { %v862_v22 = vpop.eup %861 }
 0x540   :  { %632 = vmatmul.f32.vlgmr.msra.gmra.mxu0 %v862_v22 }
 0x548   :  { %755 = vmatmul.f32.vlgmr.msrb.gmra.mxu0 %v1473_v48 }
 0x550   :  { %758 = vmatmul.f32.gmra.mxu0 %v1495_v59 }
 0x558   :  { %761 = vmatmul.f32.gmra.mxu0 %v860_v6 }
 0x560   :  { %764 = vmatmul.f32.gmra.mxu0 %v862_v22 }
 0x5bd   :  { %v633_v25 = vpop.f32.mrf.mxu0 }
 0x5be   :  { %v636_v26 = vadd.f32 %v633_v25, %v484_v24 }
 0x5c0   :  { %863 = vtanh.f32 %v636_v26 }
 0x5c5   :  { %v756_v28 = vpop.f32.mrf.mxu0 }
 0x5c6   :  { %v864_v29 = vpop.eup %863  ;;  %v757_v30 = vadd.f32 %v838_v27, %v756_v28 }
 0x5c7   :  { %656 = vmatmul.f32.vlgmr.msrb.gmra.mxu1 %v864_v29  ;;  %767 = vmatmul.f32.gmra.mxu0 %v864_v29 }
 0x5c8   :  { %780 = vst [vmem:[#allocation14] sm:$0xff] %v757_v30 }
 0x5cd   :  { %v759_v31 = vpop.f32.mrf.mxu0 }
 0x5ce   :  { %v760_v32 = vadd.f32 %v838_v27, %v759_v31 }
 0x5d0   :  { %781 = vst [vmem:[#allocation14 + $0x8] sm:$0xff] %v760_v32 }
 0x5d5   :  { %v762_v33 = vpop.f32.mrf.mxu0 }
 0x5d6   :  { %v763_v34 = vadd.f32 %v838_v27, %v762_v33 }
 0x5d8   :  { %782 = vst [vmem:[#allocation14 + $0x10] sm:$0xff] %v763_v34 }
 0x5dd   :  { %v765_v35 = vpop.f32.mrf.mxu0 }
 0x5de   :  { %v766_v37 = vadd.f32 %v838_v27, %v765_v35 }
 0x5e0   :  { %783 = vst [vmem:[#allocation14 + $0x18] sm:$0xff] %v766_v37 }
 0x644   :  { %v657_v39 = vpop.f32.mrf.mxu1  ;;  %v768_v40 = vpop.f32.mrf.mxu0 }
 0x645   :  { %v660_v42 = vadd.f32 %v657_v39, %v487_v36  ;;  %v769_v43 = vadd.f32 %v838_v27, %v768_v40 }
 0x647   :  { %865 = vtanh.f32 %v660_v42  ;;  %784 = vst [vmem:[#allocation14 + $0x20] sm:$0xff] %v769_v43 }
 0x64d   :  { %v866_v44 = vpop.eup %865 }
 0x64e   :  { %680 = vmatmul.f32.vlgmr.msra.gmra.mxu2 %v866_v44  ;;  %770 = vmatmul.f32.gmra.mxu0 %v866_v44 }
 0x6cb   :  { %v771_v48 = vpop.f32.mrf.mxu0 }
 0x6cc   :  { %v772_v49 = vadd.f32 %v838_v27, %v771_v48 }
 0x6ce   :  { %785 = vst [vmem:[#allocation14 + $0x28] sm:$0xff] %v772_v49 }
 0x6d1   :  { %v681_v51 = vpop.f32.mrf.mxu2 }
 0x6d2   :  { %v684_v54 = vadd.f32 %v681_v51, %v490_v50 }
 0x6d4   :  { %867 = vtanh.f32 %v684_v54 }
 0x6da   :  { %v868_v55 = vpop.eup %867 }
 0x6db   :  { %704 = vmatmul.f32.vlgmr.msra.gmra.mxu3 %v868_v55  ;;  %773 = vmatmul.f32.gmra.mxu0 %v868_v55 }
 0x758   :  { %v774_v56 = vpop.f32.mrf.mxu0 }
 0x759   :  { %v775_v57 = vadd.f32 %v838_v27, %v774_v56 }
 0x75b   :  { %786 = vst [vmem:[#allocation14 + $0x30] sm:$0xff] %v775_v57 }
 0x75e   :  { %v705_v59 = vpop.f32.mrf.mxu3 }
 0x75f   :  { %v708_v52 = vadd.f32 %v705_v59, %v493_v58 }
 0x761   :  { %869 = vtanh.f32 %v708_v52 }
 0x767   :  { %v870_v60 = vpop.eup %869 }
 0x768   :  { %776 = vmatmul.f32.gmra.mxu0 %v870_v60 }
 0x7e5   :  { %v777_v61 = vpop.f32.mrf.mxu0 }
 0x7e6   :  { %v778_v62 = vadd.f32 %v838_v27, %v777_v61 }
 0x7e8   :  { %787 = vst [vmem:[#allocation14 + $0x38] sm:$0xff] %v778_v62 }
 0x7e9   :  { %800 = dma.vmem_to_hbm [thread:$0]  %s793_s20, 1024, %s795_s1, [#allocation5], %s1050_s17, %s1050_s17, %s1051_s18  }
 0x7ea   :  { %1047 = dma.done.wait [#allocation5], 1024  }
 0x7eb   :  { %1048 = vsyncadd [#allocation5], 4294966272 }
 0x7ec   :  { %805 = vsyncpa [#allocation4], 1 }
 0x7ed   :  { %806 = vsyncpa [#allocation7], 1 }
 0x7ee   :  { %807 = vsyncpa [#allocation10], 1 }
 0x7ef   :  { %808 = vsyncpa [#allocation13], 1 }
 0x7f0   :  { %809 = vsyncpa [#allocation5], 1 }

</bundles_post_ra>
